<compile_context>
chip_gen: v7x
topology: tpu7x:2x2x1
jax: 0.10.0
libtpu: 0.0.40
codegen_flags: <defaults>
</compile_context>

<pallas_src>
import functools

import jax
import jax.numpy as jnp
from jax.experimental import pallas as pl
from jax.experimental.pallas import tpu as pltpu

INPUT_DIM = 784
HIDDEN_DIM = 400
LATENT_DIM = 20
HEAD_DIM = 128          # fused [mu | logvar] head, zero-padded 40 -> 128 (lane-dense store)


def _round_up(n, m):
    return ((n + m - 1) // m) * m


def _sigmoid_compute_dtype():
    """bf16 EUP exists on v6e/v7x; keep the sigmoid exp in f32 on v5e and older."""
    try:
        kind = jax.devices()[0].device_kind.lower()
    except Exception:
        return jnp.float32
    if "v6" in kind or "v7" in kind:
        return jnp.bfloat16
    return jnp.float32


def vae_forward_kernel(
    x_ref, eps_ref,
    w1_ref, b1_ref,
    w2_ref, b2_ref,      # fused+padded [mu | logvar | 0] head: (400, 128) / (1, 128)
    w3_ref, b3_ref,
    w4_ref, b4_ref,
    recon_ref, mulogvar_ref,
    *, sigmoid_dtype,
):
    f32 = jnp.float32
    bf16 = jnp.bfloat16

    x = x_ref[...]                                                       # (TB, 784) bf16

    # encode: h1 = relu(x @ W1 + b1)   (bf16 MXU operands, f32 accumulation)
    h1 = jnp.dot(x, w1_ref[...], preferred_element_type=f32) + b1_ref[...]
    h1 = jnp.maximum(h1, 0.0)                                            # (TB, 400) f32

    # fused mu/logvar head: one lane-dense (400 -> 128) matmul, one unmasked store
    ml = jnp.dot(h1.astype(bf16), w2_ref[...], preferred_element_type=f32) + b2_ref[...]
    mu = ml[:, :LATENT_DIM]                                              # (TB, 20)
    logvar = ml[:, LATENT_DIM:2 * LATENT_DIM]                            # (TB, 20)

    # reparameterize: z = mu + eps * exp(0.5 * logvar)   (f32 VPU/EUP; tiny)
    z = mu + eps_ref[...] * jnp.exp(0.5 * logvar)                        # (TB, 20)

    # decode: h3 = relu(z @ W3 + b3); logits = h3 @ W4 + b4
    h3 = jnp.dot(z.astype(bf16), w3_ref[...], preferred_element_type=f32) + b3_ref[...]
    h3 = jnp.maximum(h3, 0.0)                                            # (TB, 400)
    logits = jnp.dot(h3.astype(bf16), w4_ref[...], preferred_element_type=f32) + b4_ref[...]

    # numerically-stable sigmoid: the big exp runs in bf16 on v6e/v7x (f32 on v5e);
    # the approx reciprocal stays on the f32 vrcp path.
    e = jnp.exp(-jnp.abs(logits.astype(sigmoid_dtype))).astype(f32)
    r = pl.reciprocal(1.0 + e, approx=True)
    recon = jnp.where(logits >= 0.0, r, e * r)                           # (TB, 784) f32
    recon_ref[...] = recon.astype(recon_ref.dtype)
    mulogvar_ref[...] = ml                                               # (TB, 128)


def prepare_params(p):
    """Fuse mu/logvar heads, zero-pad the head to 128 cols, cast weights to bf16."""
    bf16 = jnp.bfloat16
    f32 = jnp.float32
    pad_cols = HEAD_DIM - 2 * LATENT_DIM
    w2 = jnp.concatenate(
        [p["w2m"], p["w2v"], jnp.zeros((HIDDEN_DIM, pad_cols), f32)], axis=1)
    b2 = jnp.concatenate(
        [p["b2m"], p["b2v"], jnp.zeros((1, pad_cols), f32)], axis=1)
    return {
        "w1": p["w1"].astype(bf16),
        "b1": p["b1"],
        "w2": w2.astype(bf16),                       # (400, 128) bf16
        "b2": b2,                                    # (1, 128) f32
        "w3": p["w3"].astype(bf16),
        "b3": p["b3"],
        "w4": p["w4"].astype(bf16),
        "b4": p["b4"],
    }


def vae_forward(x, eps, kp, *, tb_max=512, recon_dtype=jnp.float32):
    """x: (B, INPUT_DIM) f32, eps: (B, LATENT_DIM) f32 (the randn_like draw)."""
    B = x.shape[0]
    # Sublane-aligned batch tile; at least 2 grid steps when the batch allows it so that
    # both v7x TensorCores get work, capped at tb_max (amortizes per-step overhead).
    TB = max(8, min(tb_max, _round_up(max(1, -(-B // 2)), 8)))
    B_pad = _round_up(B, TB)
    if B_pad != B:
        x = jnp.pad(x, ((0, B_pad - B), (0, 0)))
        eps = jnp.pad(eps, ((0, B_pad - B), (0, 0)))
    # x only feeds the bf16 MXU matmul -> ship it to the kernel as bf16 (half the DMA).
    x = x.astype(jnp.bfloat16)

    grid = (B_pad // TB,)

    def row_spec(ncols):                      # batch-tiled activations / outputs
        return pl.BlockSpec((TB, ncols), lambda i: (i, 0))

    def fixed_spec(shape):                    # weights: VMEM-resident, single buffer
        return pl.BlockSpec(shape, lambda i: (0, 0), pipeline_mode=pl.Buffered(1))

    kernel = functools.partial(vae_forward_kernel,
                               sigmoid_dtype=_sigmoid_compute_dtype())

    grid_spec = pltpu.PrefetchScalarGridSpec(
        num_scalar_prefetch=0,
        grid=grid,
        in_specs=[
            row_spec(INPUT_DIM),                          # x (bf16)
            row_spec(LATENT_DIM),                         # eps (f32)
            fixed_spec((INPUT_DIM, HIDDEN_DIM)),          # w1
            fixed_spec((1, HIDDEN_DIM)),                  # b1
            fixed_spec((HIDDEN_DIM, HEAD_DIM)),           # w2 (fused mu|logvar, padded)
            fixed_spec((1, HEAD_DIM)),                    # b2
            fixed_spec((LATENT_DIM, HIDDEN_DIM)),         # w3
            fixed_spec((1, HIDDEN_DIM)),                  # b3
            fixed_spec((HIDDEN_DIM, INPUT_DIM)),          # w4
            fixed_spec((1, INPUT_DIM)),                   # b4
        ],
        out_specs=(
            row_spec(INPUT_DIM),                          # recon
            row_spec(HEAD_DIM),                           # fused [mu | logvar | 0]
        ),
    )

    recon, mulogvar = pl.pallas_call(
        kernel,
        out_shape=(
            jax.ShapeDtypeStruct((B_pad, INPUT_DIM), recon_dtype),
            jax.ShapeDtypeStruct((B_pad, HEAD_DIM), jnp.float32),
        ),
        grid_spec=grid_spec,
        compiler_params=pltpu.CompilerParams(
            dimension_semantics=("parallel",),    # batch tiles are independent
            vmem_limit_bytes=32 << 20,            # headroom for TB up to 512
        ),
    )(
        x, eps,
        kp["w1"], kp["b1"], kp["w2"], kp["b2"],
        kp["w3"], kp["b3"], kp["w4"], kp["b4"],
    )

    mu = mulogvar[:B, :LATENT_DIM]
    logvar = mulogvar[:B, LATENT_DIM:2 * LATENT_DIM]
    return recon[:B], mu, logvar


def init_params(key):
    """Deterministic synthetic parameters (shapes from VAE.__init__), f32."""
    ks = jax.random.split(key, 10)

    def linear(kw, kb, fan_in, fan_out):
        bound = 1.0 / jnp.sqrt(jnp.float32(fan_in))
        w = jax.random.uniform(kw, (fan_in, fan_out), jnp.float32, -bound, bound)
        b = jax.random.uniform(kb, (1, fan_out), jnp.float32, -bound, bound)
        return w, b

    w1, b1 = linear(ks[0], ks[1], INPUT_DIM, HIDDEN_DIM)
    w2m, b2m = linear(ks[2], ks[3], HIDDEN_DIM, LATENT_DIM)
    w2v, b2v = linear(ks[4], ks[5], HIDDEN_DIM, LATENT_DIM)
    w3, b3 = linear(ks[6], ks[7], LATENT_DIM, HIDDEN_DIM)
    w4, b4 = linear(ks[8], ks[9], HIDDEN_DIM, INPUT_DIM)
    return {
        "w1": w1, "b1": b1,
        "w2m": w2m, "b2m": b2m,
        "w2v": w2v, "b2v": b2v,
        "w3": w3, "b3": b3,
        "w4": w4, "b4": b4,
    }


def reference_forward(x, eps, kp):
    """Pure-JAX reference mirroring the kernel math (bf16 MXU operands, f32 accumulation)."""
    f32 = jnp.float32
    bf16 = jnp.bfloat16

    def lin(a, w, b):
        return jnp.dot(a.astype(bf16), w, preferred_element_type=f32) + b

    h1 = jnp.maximum(lin(x, kp["w1"], kp["b1"]), 0.0)
    ml = lin(h1, kp["w2"], kp["b2"])
    mu, logvar = ml[:, :LATENT_DIM], ml[:, LATENT_DIM:2 * LATENT_DIM]
    z = mu + eps * jnp.exp(0.5 * logvar)
    h3 = jnp.maximum(lin(z, kp["w3"], kp["b3"]), 0.0)
    recon = jax.nn.sigmoid(lin(h3, kp["w4"], kp["b4"]))
    return recon, mu, logvar


if __name__ == "__main__":
    key = jax.random.PRNGKey(0)
    k_param, k_x, k_eps = jax.random.split(key, 3)

    B = 2
    # Forward does x.view(-1, 784): feed an image-shaped batch and flatten.
    x_img = jax.random.uniform(k_x, (B, 1, 28, 28), jnp.float32)   # 1*28*28 == 784
    x = x_img.reshape(-1, INPUT_DIM)

    # eps = torch.randn_like(std): drawn here deterministically and passed in.
    eps = jax.random.normal(k_eps, (B, LATENT_DIM), jnp.float32)

    params = init_params(k_param)
    kparams = prepare_params(params)

    recon, mu, logvar = vae_forward(x, eps, kparams)
    jax.block_until_ready((recon, mu, logvar))

    # correctness check against pure-JAX reference (bf16 weights -> loosened tolerances)
    r_ref, mu_ref, lv_ref = reference_forward(x, eps, kparams)
    assert recon.shape == (B, INPUT_DIM)
    assert mu.shape == (B, LATENT_DIM) and logvar.shape == (B, LATENT_DIM)
    assert jnp.allclose(mu, mu_ref, atol=5e-3, rtol=5e-3)
    assert jnp.allclose(logvar, lv_ref, atol=5e-3, rtol=5e-3)
    assert jnp.allclose(recon, r_ref, atol=2e-2)

    print("KERNEL_OK")
</pallas_src>

<mosaic_0001>
module attributes {stable_mosaic.version = 11 : i64} {
  func.func @vae_forward_kernel(%arg0: i32, %arg1: memref<8x784xbf16, #tpu.memory_space<vmem>>, %arg2: memref<8x20xf32, #tpu.memory_space<vmem>>, %arg3: memref<784x400xbf16, #tpu.memory_space<vmem>>, %arg4: memref<1x400xf32, #tpu.memory_space<vmem>>, %arg5: memref<400x128xbf16, #tpu.memory_space<vmem>>, %arg6: memref<1x128xf32, #tpu.memory_space<vmem>>, %arg7: memref<20x400xbf16, #tpu.memory_space<vmem>>, %arg8: memref<1x400xf32, #tpu.memory_space<vmem>>, %arg9: memref<400x784xbf16, #tpu.memory_space<vmem>>, %arg10: memref<1x784xf32, #tpu.memory_space<vmem>>, %arg11: memref<8x784xf32, #tpu.memory_space<vmem>>, %arg12: memref<8x128xf32, #tpu.memory_space<vmem>>) attributes {dimension_semantics = [#tpu.dimension_semantics<parallel>], iteration_bounds = array<i64: 1>, scalar_prefetch = 0 : i64, scratch_operands = 0 : i64, tpu.core_type = #tpu.core_type<tc>, window_params = [{transform_indices = @transform_0, window_bounds = array<i64: 8, 784>}, {transform_indices = @transform_1, window_bounds = array<i64: 8, 20>}, {pipeline_mode = #tpu.pipeline_mode<synchronous>, transform_indices = @transform_2, window_bounds = array<i64: 784, 400>}, {pipeline_mode = #tpu.pipeline_mode<synchronous>, transform_indices = @transform_3, window_bounds = array<i64: 1, 400>}, {pipeline_mode = #tpu.pipeline_mode<synchronous>, transform_indices = @transform_4, window_bounds = array<i64: 400, 128>}, {pipeline_mode = #tpu.pipeline_mode<synchronous>, transform_indices = @transform_5, window_bounds = array<i64: 1, 128>}, {pipeline_mode = #tpu.pipeline_mode<synchronous>, transform_indices = @transform_6, window_bounds = array<i64: 20, 400>}, {pipeline_mode = #tpu.pipeline_mode<synchronous>, transform_indices = @transform_7, window_bounds = array<i64: 1, 400>}, {pipeline_mode = #tpu.pipeline_mode<synchronous>, transform_indices = @transform_8, window_bounds = array<i64: 400, 784>}, {pipeline_mode = #tpu.pipeline_mode<synchronous>, transform_indices = @transform_9, window_bounds = array<i64: 1, 784>}, {transform_indices = @transform_10, window_bounds = array<i64: 8, 784>}, {transform_indices = @transform_11, window_bounds = array<i64: 8, 128>}]} {
    %c0 = arith.constant 0 : index
    %c0_0 = arith.constant 0 : index
    %0 = vector.load %arg1[%c0, %c0_0] : memref<8x784xbf16, #tpu.memory_space<vmem>>, vector<8x784xbf16>
    %c0_1 = arith.constant 0 : index
    %c0_2 = arith.constant 0 : index
    %1 = vector.load %arg3[%c0_1, %c0_2] : memref<784x400xbf16, #tpu.memory_space<vmem>>, vector<784x400xbf16>
    %cst = arith.constant dense<0.000000e+00> : vector<8x400xf32>
    %2 = tpu.matmul %0, %1, %cst {dimension_numbers = #tpu.dot_dimension_numbers<[1], [0], [0], [1], [0, 0, 1, 1], [], []>} : vector<8x784xbf16>, vector<784x400xbf16>, vector<8x400xf32> -> vector<8x400xf32>
    %c0_3 = arith.constant 0 : index
    %c0_4 = arith.constant 0 : index
    %3 = vector.load %arg4[%c0_3, %c0_4] : memref<1x400xf32, #tpu.memory_space<vmem>>, vector<1x400xf32>
    %4 = vector.broadcast %3 : vector<1x400xf32> to vector<8x400xf32>
    %5 = arith.addf %2, %4 : vector<8x400xf32>
    %cst_5 = arith.constant 0.000000e+00 : f32
    %6 = vector.broadcast %cst_5 : f32 to vector<8x400xf32>
    %7 = arith.maximumf %5, %6 : vector<8x400xf32>
    %8 = arith.truncf %7 : vector<8x400xf32> to vector<8x400xbf16>
    %c0_6 = arith.constant 0 : index
    %c0_7 = arith.constant 0 : index
    %9 = vector.load %arg5[%c0_6, %c0_7] : memref<400x128xbf16, #tpu.memory_space<vmem>>, vector<400x128xbf16>
    %cst_8 = arith.constant dense<0.000000e+00> : vector<8x128xf32>
    %10 = tpu.matmul %8, %9, %cst_8 {dimension_numbers = #tpu.dot_dimension_numbers<[1], [0], [0], [1], [0, 0, 1, 1], [], []>} : vector<8x400xbf16>, vector<400x128xbf16>, vector<8x128xf32> -> vector<8x128xf32>
    %c0_9 = arith.constant 0 : index
    %c0_10 = arith.constant 0 : index
    %11 = vector.load %arg6[%c0_9, %c0_10] : memref<1x128xf32, #tpu.memory_space<vmem>>, vector<1x128xf32>
    %12 = vector.broadcast %11 : vector<1x128xf32> to vector<8x128xf32>
    %13 = arith.addf %10, %12 : vector<8x128xf32>
    %14 = vector.extract_strided_slice %13 {offsets = [0, 0], sizes = [8, 20], strides = [1, 1]} : vector<8x128xf32> to vector<8x20xf32>
    %15 = vector.extract_strided_slice %13 {offsets = [0, 20], sizes = [8, 20], strides = [1, 1]} : vector<8x128xf32> to vector<8x20xf32>
    %c0_11 = arith.constant 0 : index
    %c0_12 = arith.constant 0 : index
    %16 = vector.load %arg2[%c0_11, %c0_12] : memref<8x20xf32, #tpu.memory_space<vmem>>, vector<8x20xf32>
    %cst_13 = arith.constant 5.000000e-01 : f32
    %17 = vector.broadcast %cst_13 : f32 to vector<8x20xf32>
    %18 = arith.mulf %17, %15 : vector<8x20xf32>
    %19 = math.exp %18 : vector<8x20xf32>
    %20 = arith.mulf %16, %19 : vector<8x20xf32>
    %21 = arith.addf %14, %20 : vector<8x20xf32>
    %22 = arith.truncf %21 : vector<8x20xf32> to vector<8x20xbf16>
    %c0_14 = arith.constant 0 : index
    %c0_15 = arith.constant 0 : index
    %23 = vector.load %arg7[%c0_14, %c0_15] : memref<20x400xbf16, #tpu.memory_space<vmem>>, vector<20x400xbf16>
    %cst_16 = arith.constant dense<0.000000e+00> : vector<8x400xf32>
    %24 = tpu.matmul %22, %23, %cst_16 {dimension_numbers = #tpu.dot_dimension_numbers<[1], [0], [0], [1], [0, 0, 1, 1], [], []>} : vector<8x20xbf16>, vector<20x400xbf16>, vector<8x400xf32> -> vector<8x400xf32>
    %c0_17 = arith.constant 0 : index
    %c0_18 = arith.constant 0 : index
    %25 = vector.load %arg8[%c0_17, %c0_18] : memref<1x400xf32, #tpu.memory_space<vmem>>, vector<1x400xf32>
    %26 = vector.broadcast %25 : vector<1x400xf32> to vector<8x400xf32>
    %27 = arith.addf %24, %26 : vector<8x400xf32>
    %cst_19 = arith.constant 0.000000e+00 : f32
    %28 = vector.broadcast %cst_19 : f32 to vector<8x400xf32>
    %29 = arith.maximumf %27, %28 : vector<8x400xf32>
    %30 = arith.truncf %29 : vector<8x400xf32> to vector<8x400xbf16>
    %c0_20 = arith.constant 0 : index
    %c0_21 = arith.constant 0 : index
    %31 = vector.load %arg9[%c0_20, %c0_21] : memref<400x784xbf16, #tpu.memory_space<vmem>>, vector<400x784xbf16>
    %cst_22 = arith.constant dense<0.000000e+00> : vector<8x784xf32>
    %32 = tpu.matmul %30, %31, %cst_22 {dimension_numbers = #tpu.dot_dimension_numbers<[1], [0], [0], [1], [0, 0, 1, 1], [], []>} : vector<8x400xbf16>, vector<400x784xbf16>, vector<8x784xf32> -> vector<8x784xf32>
    %c0_23 = arith.constant 0 : index
    %c0_24 = arith.constant 0 : index
    %33 = vector.load %arg10[%c0_23, %c0_24] : memref<1x784xf32, #tpu.memory_space<vmem>>, vector<1x784xf32>
    %34 = vector.broadcast %33 : vector<1x784xf32> to vector<8x784xf32>
    %35 = arith.addf %32, %34 : vector<8x784xf32>
    %36 = math.absf %35 : vector<8x784xf32>
    %cst_25 = arith.constant 0.000000e+00 : f32
    %37 = vector.broadcast %cst_25 : f32 to vector<8x784xf32>
    %38 = arith.subf %37, %36 : vector<8x784xf32>
    %39 = math.exp %38 : vector<8x784xf32>
    %cst_26 = arith.constant 1.000000e+00 : f32
    %40 = vector.broadcast %cst_26 : f32 to vector<8x784xf32>
    %41 = arith.addf %40, %39 : vector<8x784xf32>
    %42 = tpu.reciprocal %41 {approx = true} : vector<8x784xf32> -> vector<8x784xf32>
    %cst_27 = arith.constant 0.000000e+00 : f32
    %43 = vector.broadcast %cst_27 : f32 to vector<8x784xf32>
    %44 = arith.cmpf oge, %35, %43 : vector<8x784xf32>
    %45 = arith.mulf %39, %42 : vector<8x784xf32>
    %46 = arith.select %44, %42, %45 : vector<8x784xi1>, vector<8x784xf32>
    %c0_28 = arith.constant 0 : index
    %c0_29 = arith.constant 0 : index
    %47 = vector.load %arg11[%c0_28, %c0_29] : memref<8x784xf32, #tpu.memory_space<vmem>>, vector<8x784xf32>
    tpu.vector_store %arg11[%c0_28, %c0_29], %46 {strides = array<i32>} : memref<8x784xf32, #tpu.memory_space<vmem>>, vector<8x784xf32>,
    %c0_30 = arith.constant 0 : index
    %c0_31 = arith.constant 0 : index
    %48 = vector.load %arg12[%c0_30, %c0_31] : memref<8x128xf32, #tpu.memory_space<vmem>>, vector<8x128xf32>
    tpu.vector_store %arg12[%c0_30, %c0_31], %13 {strides = array<i32>} : memref<8x128xf32, #tpu.memory_space<vmem>>, vector<8x128xf32>,
    return
  }
  func.func @transform_0(%arg0: i32) -> (i32, i32) {
    %c0_i32 = arith.constant 0 : i32
    %c0_i32_0 = arith.constant 0 : i32
    return %arg0, %c0_i32 : i32, i32
  }
  func.func @transform_1(%arg0: i32) -> (i32, i32) {
    %c0_i32 = arith.constant 0 : i32
    %c0_i32_0 = arith.constant 0 : i32
    return %arg0, %c0_i32 : i32, i32
  }
  func.func @transform_2(%arg0: i32) -> (i32, i32) {
    %c0_i32 = arith.constant 0 : i32
    %c0_i32_0 = arith.constant 0 : i32
    %c0_i32_1 = arith.constant 0 : i32
    return %c0_i32, %c0_i32_0 : i32, i32
  }
  func.func @transform_3(%arg0: i32) -> (i32, i32) {
    %c0_i32 = arith.constant 0 : i32
    %c0_i32_0 = arith.constant 0 : i32
    %c0_i32_1 = arith.constant 0 : i32
    return %c0_i32, %c0_i32_0 : i32, i32
  }
  func.func @transform_4(%arg0: i32) -> (i32, i32) {
    %c0_i32 = arith.constant 0 : i32
    %c0_i32_0 = arith.constant 0 : i32
    %c0_i32_1 = arith.constant 0 : i32
    return %c0_i32, %c0_i32_0 : i32, i32
  }
  func.func @transform_5(%arg0: i32) -> (i32, i32) {
    %c0_i32 = arith.constant 0 : i32
    %c0_i32_0 = arith.constant 0 : i32
    %c0_i32_1 = arith.constant 0 : i32
    return %c0_i32, %c0_i32_0 : i32, i32
  }
  func.func @transform_6(%arg0: i32) -> (i32, i32) {
    %c0_i32 = arith.constant 0 : i32
    %c0_i32_0 = arith.constant 0 : i32
    %c0_i32_1 = arith.constant 0 : i32
    return %c0_i32, %c0_i32_0 : i32, i32
  }
  func.func @transform_7(%arg0: i32) -> (i32, i32) {
    %c0_i32 = arith.constant 0 : i32
    %c0_i32_0 = arith.constant 0 : i32
    %c0_i32_1 = arith.constant 0 : i32
    return %c0_i32, %c0_i32_0 : i32, i32
  }
  func.func @transform_8(%arg0: i32) -> (i32, i32) {
    %c0_i32 = arith.constant 0 : i32
    %c0_i32_0 = arith.constant 0 : i32
    %c0_i32_1 = arith.constant 0 : i32
    return %c0_i32, %c0_i32_0 : i32, i32
  }
  func.func @transform_9(%arg0: i32) -> (i32, i32) {
    %c0_i32 = arith.constant 0 : i32
    %c0_i32_0 = arith.constant 0 : i32
    %c0_i32_1 = arith.constant 0 : i32
    return %c0_i32, %c0_i32_0 : i32, i32
  }
  func.func @transform_10(%arg0: i32) -> (i32, i32) {
    %c0_i32 = arith.constant 0 : i32
    %c0_i32_0 = arith.constant 0 : i32
    return %arg0, %c0_i32 : i32, i32
  }
  func.func @transform_11(%arg0: i32) -> (i32, i32) {
    %c0_i32 = arith.constant 0 : i32
    %c0_i32_0 = arith.constant 0 : i32
    return %arg0, %c0_i32 : i32, i32
  }
}

</mosaic_0001>

<bundles_post_ra>
// kernel: tpu_custom_call.1
= control target key start
LH: loop header
LB: loop body
LE: loop exit
PB: predicated region body
PF: predicated region fallthrough
CT: control target
= control target key end

     0   :  { %17 = vsyncpa [#allocation3], 0  ;;  %v4817_v2 = vmov 0   ;;  %vm1266_vm0 = vcmask 130048   ;;  %s6279_s0 = inlined_call_operand.vmem [shape: bf16[8,784], index: 0, kind: input, shape index: {}]   ;;  %s6280_s1 = inlined_call_operand.vmem [shape: f32[8,20], index: 1, kind: input, shape index: {}]   ;;  %s6281_s2 = inlined_call_operand.vmem [shape: bf16[784,400], index: 2, kind: input, shape index: {}]   ;;  %s6282_s3 = inlined_call_operand.vmem [shape: f32[1,400], index: 3, kind: input, shape index: {}]   ;;  %s6283_s4 = inlined_call_operand.vmem [shape: bf16[400,128], index: 4, kind: input, shape index: {}]   ;;  %s6284_s5 = inlined_call_operand.vmem [shape: f32[1,128], index: 5, kind: input, shape index: {}]   ;;  %s6285_s6 = inlined_call_operand.vmem [shape: bf16[20,400], index: 6, kind: input, shape index: {}]   ;;  %s6286_s7 = inlined_call_operand.vmem [shape: f32[1,400], index: 7, kind: input, shape index: {}]   ;;  %s6287_s8 = inlined_call_operand.vmem [shape: bf16[400,784], index: 8, kind: input, shape index: {}]   ;;  %s6288_s9 = inlined_call_operand.vmem [shape: f32[1,784], index: 9, kind: input, shape index: {}]   ;;  %s6289_s10 = inlined_call_operand.hbm [shape: f32[8,784], index: 10, kind: output, shape index: {0}]   ;;  %s6290_s11 = inlined_call_operand.hbm [shape: f32[8,128], index: 11, kind: output, shape index: {1}]  }
   0x1   :  { %v4152_v0 = vld [vmem:[%s6281_s2 + $0x4] ss:$16 sps:$4 sm:$0xff]   ;;  %1425 = vmatprep.mubr.bf16.mxu1 %v4817_v2  ;;  %v4156_v3 = vld [vmem:[%s6281_s2] ss:$16 sps:$4 sm:$0xff]   ;;  %v4160_v6 = vld [vmem:[%s6279_s0 + $0x18] ss:$0 sps:$4 sm:$0xff]  }
   0x2   :  { %v4154_v1 = vld [vmem:[%s6281_s2 + $0x604] ss:$16 sps:$4 sm:$0xff]   ;;  %1270 = vmatprep.subr.bf16.mxu0 %v4152_v0  ;;  %v4157_v4 = vld [vmem:[%s6281_s2 + $0x600] ss:$16 sps:$4 sm:$0xff]   ;;  %v4161_v7 = vld [vmem:[%s6281_s2 + $0x8] ss:$16 sps:$4 sm:$0xff]  }
   0x3   :  { %1393 = vmatprep.subr.bf16.mxu1 %v4154_v1  ;;  %v4158_v5 = vld [vmem:[%s6281_s2 + $0x24] ss:$16 sps:$4 sm:$0xff]   ;;  %1271 = vmatpush1.bf16.msra.mxu0 %v4156_v3  ;;  %v4163_v8 = vld [vmem:[%s6281_s2 + $0xc] ss:$16 sps:$4 sm:$0xff]   ;;  %v4164_v9 = vld [vmem:[%s6281_s2 + $0x20] ss:$16 sps:$4 sm:$0xff]  }
   0x4   :  { %1394 = vmatpush1.bf16.msra.mxu1 %v4157_v4  ;;  %1272 = vmatprep.subr.bf16.mxu0 %v4158_v5  ;;  %v4165_v10 = vld [vmem:[%s6281_s2 + $0x44] ss:$16 sps:$4 sm:$0xff]   ;;  %v4167_v11 = vld [vmem:[%s6281_s2 + $0x28] ss:$16 sps:$4 sm:$0xff]   ;;  %v4169_v12 = vld [vmem:[%s6281_s2 + $0x2c] ss:$16 sps:$4 sm:$0xff]  }
   0x5   :  { %1434 = vmatprep.subr.bf16.mxu1 %v4163_v8  ;;  %v4170_v13 = vld [vmem:[%s6281_s2 + $0x40] ss:$16 sps:$4 sm:$0xff]   ;;  %v4171_v14 = vld [vmem:[%s6281_s2 + $0x64] ss:$16 sps:$4 sm:$0xff]   ;;  %v4175_v15 = vld [vmem:[%s6281_s2 + $0x4c] ss:$16 sps:$4 sm:$0xff]  }
   0x6   :  { %v4173_v16 = vld [vmem:[%s6281_s2 + $0x48] ss:$16 sps:$4 sm:$0xff]   ;;  %v4176_v17 = vld [vmem:[%s6281_s2 + $0x60] ss:$16 sps:$4 sm:$0xff]   ;;  %v4177_v18 = vld [vmem:[%s6281_s2 + $0x84] ss:$16 sps:$4 sm:$0xff]  }
   0x7   :  { %3840 = vmatmul.mubr.msk.bf16.vlgmr.msra.gmra.mrb[0].mxu1 %vm1266_vm0, %v4160_v6  ;;  %1273 = vmatpush1.bf16.msra.mxu0 %v4164_v9  ;;  %v4181_v19 = vld [vmem:[%s6281_s2 + $0x6c] ss:$16 sps:$4 sm:$0xff]   ;;  %v4179_v20 = vld [vmem:[%s6281_s2 + $0x68] ss:$16 sps:$4 sm:$0xff]   ;;  %v4182_v21 = vld [vmem:[%s6281_s2 + $0x80] ss:$16 sps:$4 sm:$0xff]  }
   0x8   :  { %1435 = vmatpush1.bf16.msra.mxu1 %v4161_v7  ;;  %1274 = vmatprep.subr.bf16.mxu0 %v4165_v10  ;;  %v4183_v22 = vld [vmem:[%s6281_s2 + $0xa4] ss:$16 sps:$4 sm:$0xff]   ;;  %v4187_v23 = vld [vmem:[%s6281_s2 + $0x8c] ss:$16 sps:$4 sm:$0xff]   ;;  %v4185_v24 = vld [vmem:[%s6281_s2 + $0x88] ss:$16 sps:$4 sm:$0xff]  }
   0x9   :  { %1436 = vmatprep.subr.bf16.mxu1 %v4169_v12  ;;  %v4188_v25 = vld [vmem:[%s6281_s2 + $0xa0] ss:$16 sps:$4 sm:$0xff]   ;;  %v4189_v26 = vld [vmem:[%s6281_s2 + $0xc4] ss:$16 sps:$4 sm:$0xff]   ;;  %v4193_v27 = vld [vmem:[%s6281_s2 + $0xac] ss:$16 sps:$4 sm:$0xff]  }
   0xa   :  { %v4191_v28 = vld [vmem:[%s6281_s2 + $0xa8] ss:$16 sps:$4 sm:$0xff]   ;;  %v4194_v29 = vld [vmem:[%s6281_s2 + $0xc0] ss:$16 sps:$4 sm:$0xff]   ;;  %v4195_v30 = vld [vmem:[%s6281_s2 + $0xe4] ss:$16 sps:$4 sm:$0xff]  }
   0xb   :  { %1275 = vmatpush1.bf16.msra.mxu0 %v4170_v13  ;;  %v4199_v31 = vld [vmem:[%s6281_s2 + $0xcc] ss:$16 sps:$4 sm:$0xff]   ;;  %v4197_v32 = vld [vmem:[%s6281_s2 + $0xc8] ss:$16 sps:$4 sm:$0xff]   ;;  %v4200_v33 = vld [vmem:[%s6281_s2 + $0xe0] ss:$16 sps:$4 sm:$0xff]  }
   0xc   :  { %1437 = vmatpush1.bf16.msra.mxu1 %v4167_v11  ;;  %1276 = vmatprep.subr.bf16.mxu0 %v4171_v14  ;;  %v4201_v34 = vld [vmem:[%s6281_s2 + $0x104] ss:$16 sps:$4 sm:$0xff]   ;;  %v4205_v35 = vld [vmem:[%s6281_s2 + $0xec] ss:$16 sps:$4 sm:$0xff]   ;;  %v4203_v36 = vld [vmem:[%s6281_s2 + $0xe8] ss:$16 sps:$4 sm:$0xff]  }
   0xd   :  { %1438 = vmatprep.subr.bf16.mxu1 %v4175_v15  ;;  %v4206_v37 = vld [vmem:[%s6281_s2 + $0x100] ss:$16 sps:$4 sm:$0xff]   ;;  %v4207_v38 = vld [vmem:[%s6281_s2 + $0x124] ss:$16 sps:$4 sm:$0xff]   ;;  %v4211_v39 = vld [vmem:[%s6281_s2 + $0x10c] ss:$16 sps:$4 sm:$0xff]  }
   0xe   :  { %v4209_v40 = vld [vmem:[%s6281_s2 + $0x108] ss:$16 sps:$4 sm:$0xff]   ;;  %v4212_v41 = vld [vmem:[%s6281_s2 + $0x120] ss:$16 sps:$4 sm:$0xff]   ;;  %v4213_v42 = vld [vmem:[%s6281_s2 + $0x144] ss:$16 sps:$4 sm:$0xff]  }
   0xf   :  { %1277 = vmatpush1.bf16.msra.mxu0 %v4176_v17  ;;  %v4217_v43 = vld [vmem:[%s6281_s2 + $0x12c] ss:$16 sps:$4 sm:$0xff]   ;;  %v4215_v44 = vld [vmem:[%s6281_s2 + $0x128] ss:$16 sps:$4 sm:$0xff]   ;;  %v4218_v45 = vld [vmem:[%s6281_s2 + $0x140] ss:$16 sps:$4 sm:$0xff]  }
  0x10   :  { %1439 = vmatpush1.bf16.msra.mxu1 %v4173_v16  ;;  %1278 = vmatprep.subr.bf16.mxu0 %v4177_v18  ;;  %v4219_v46 = vld [vmem:[%s6281_s2 + $0x164] ss:$16 sps:$4 sm:$0xff]   ;;  %v4223_v47 = vld [vmem:[%s6281_s2 + $0x14c] ss:$16 sps:$4 sm:$0xff]   ;;  %v4221_v48 = vld [vmem:[%s6281_s2 + $0x148] ss:$16 sps:$4 sm:$0xff]  }
  0x11   :  { %1440 = vmatprep.subr.bf16.mxu1 %v4181_v19  ;;  %v40_v49 = vld [vmem:[%s6279_s0] sm:$0xff]  ;;  %v4229_v53 = vld [vmem:[%s6281_s2 + $0x16c] ss:$16 sps:$4 sm:$0xff]   ;;  %v4227_v54 = vld [vmem:[%s6281_s2 + $0x168] ss:$16 sps:$4 sm:$0xff]  }
  0x12   :  { %v4224_v50 = vld [vmem:[%s6281_s2 + $0x160] ss:$16 sps:$4 sm:$0xff]   ;;  %v4225_v51 = vld [vmem:[%s6281_s2 + $0x184] ss:$16 sps:$4 sm:$0xff]   ;;  %v3638_v52 = vcombine.high %v40_v49, %v40_v49  ;;  %v4235_v57 = vld [vmem:[%s6281_s2 + $0x18c] ss:$16 sps:$4 sm:$0xff]   ;;  %v3637_v7 = vcombine.low %v40_v49, %v40_v49 }
  0x13   :  { %1279 = vmatpush1.bf16.msra.mxu0 %v4182_v21  ;;  %v4230_v55 = vld [vmem:[%s6281_s2 + $0x180] ss:$16 sps:$4 sm:$0xff]   ;;  %v4231_v56 = vld [vmem:[%s6281_s2 + $0x1a4] ss:$16 sps:$4 sm:$0xff]   ;;  %v4233_v58 = vld [vmem:[%s6281_s2 + $0x188] ss:$16 sps:$4 sm:$0xff]  }
  0x14   :  { %1441 = vmatpush1.bf16.msra.mxu1 %v4179_v20  ;;  %1280 = vmatprep.subr.bf16.mxu0 %v4183_v22  ;;  %v4236_v59 = vld [vmem:[%s6281_s2 + $0x1a0] ss:$16 sps:$4 sm:$0xff]   ;;  %v4237_v60 = vld [vmem:[%s6281_s2 + $0x1c4] ss:$16 sps:$4 sm:$0xff]   ;;  %v4241_v61 = vld [vmem:[%s6281_s2 + $0x1ac] ss:$16 sps:$4 sm:$0xff]  }
  0x15   :  { %1442 = vmatprep.subr.bf16.mxu1 %v4187_v23  ;;  %1302 = vmatprep.mubr.bf16.mxu0 %v3638_v52  ;;  %v4239_v62 = vld [vmem:[%s6281_s2 + $0x1a8] ss:$16 sps:$4 sm:$0xff]   ;;  %v4242_v63 = vld [vmem:[%s6281_s2 + $0x1c0] ss:$16 sps:$4 sm:$0xff]   ;;  %v4243_v0 = vld [vmem:[%s6281_s2 + $0x1e4] ss:$16 sps:$4 sm:$0xff]  }
  0x16   :  { %1466 = vmatprep.mubr.bf16.mxu1 %v3638_v52  ;;  %v4247_v1 = vld [vmem:[%s6281_s2 + $0x1cc] ss:$16 sps:$4 sm:$0xff]   ;;  %v4245_v3 = vld [vmem:[%s6281_s2 + $0x1c8] ss:$16 sps:$4 sm:$0xff]   ;;  %v4248_v4 = vld [vmem:[%s6281_s2 + $0x1e0] ss:$16 sps:$4 sm:$0xff]  }
  0x17   :  { %1281 = vmatpush1.bf16.msra.mxu0 %v4188_v25  ;;  %v4253_v5 = vld [vmem:[%s6281_s2 + $0x204] ss:$16 sps:$4 sm:$0xff]   ;;  %v4256_v6 = vld [vmem:[%s6281_s2 + $0x1ec] ss:$16 sps:$4 sm:$0xff]   ;;  %v4251_v8 = vld [vmem:[%s6281_s2 + $0x200] ss:$16 sps:$4 sm:$0xff]  }
  0x18   :  { %1443 = vmatpush1.bf16.msra.mxu1 %v4185_v24  ;;  %1282 = vmatprep.subr.bf16.mxu0 %v4189_v26  ;;  %v4254_v9 = vld [vmem:[%s6281_s2 + $0x1e8] ss:$16 sps:$4 sm:$0xff]   ;;  %v4259_v10 = vld [vmem:[%s6281_s2 + $0x224] ss:$16 sps:$4 sm:$0xff]   ;;  %v4262_v11 = vld [vmem:[%s6281_s2 + $0x20c] ss:$16 sps:$4 sm:$0xff]  }
  0x19   :  { %1444 = vmatprep.subr.bf16.mxu1 %v4193_v27  ;;  %v4257_v12 = vld [vmem:[%s6281_s2 + $0x220] ss:$16 sps:$4 sm:$0xff]   ;;  %v4260_v13 = vld [vmem:[%s6281_s2 + $0x208] ss:$16 sps:$4 sm:$0xff]   ;;  %v4265_v14 = vld [vmem:[%s6281_s2 + $0x244] ss:$16 sps:$4 sm:$0xff]  }
  0x1a   :  { %v4268_v15 = vld [vmem:[%s6281_s2 + $0x22c] ss:$16 sps:$4 sm:$0xff]   ;;  %v4263_v16 = vld [vmem:[%s6281_s2 + $0x240] ss:$16 sps:$4 sm:$0xff]   ;;  %v4266_v17 = vld [vmem:[%s6281_s2 + $0x228] ss:$16 sps:$4 sm:$0xff]  }
  0x1b   :  { %1283 = vmatpush1.bf16.msra.mxu0 %v4194_v29  ;;  %v4271_v18 = vld [vmem:[%s6281_s2 + $0x264] ss:$16 sps:$4 sm:$0xff]   ;;  %v4274_v19 = vld [vmem:[%s6281_s2 + $0x24c] ss:$16 sps:$4 sm:$0xff]   ;;  %v4269_v20 = vld [vmem:[%s6281_s2 + $0x260] ss:$16 sps:$4 sm:$0xff]  }
  0x1c   :  { %1445 = vmatpush1.bf16.msra.mxu1 %v4191_v28  ;;  %1284 = vmatprep.subr.bf16.mxu0 %v4195_v30  ;;  %v4272_v21 = vld [vmem:[%s6281_s2 + $0x248] ss:$16 sps:$4 sm:$0xff]   ;;  %v4277_v22 = vld [vmem:[%s6281_s2 + $0x284] ss:$16 sps:$4 sm:$0xff]   ;;  %v4280_v23 = vld [vmem:[%s6281_s2 + $0x26c] ss:$16 sps:$4 sm:$0xff]  }
  0x1d   :  { %1446 = vmatprep.subr.bf16.mxu1 %v4199_v31  ;;  %v4275_v24 = vld [vmem:[%s6281_s2 + $0x280] ss:$16 sps:$4 sm:$0xff]   ;;  %v4278_v25 = vld [vmem:[%s6281_s2 + $0x268] ss:$16 sps:$4 sm:$0xff]   ;;  %v4283_v26 = vld [vmem:[%s6281_s2 + $0x2a4] ss:$16 sps:$4 sm:$0xff]  }
  0x1e   :  { %v4286_v27 = vld [vmem:[%s6281_s2 + $0x28c] ss:$16 sps:$4 sm:$0xff]   ;;  %v4281_v28 = vld [vmem:[%s6281_s2 + $0x2a0] ss:$16 sps:$4 sm:$0xff]   ;;  %v4284_v29 = vld [vmem:[%s6281_s2 + $0x288] ss:$16 sps:$4 sm:$0xff]  }
  0x1f   :  { %1285 = vmatpush1.bf16.msra.mxu0 %v4200_v33  ;;  %v4289_v30 = vld [vmem:[%s6281_s2 + $0x2c4] ss:$16 sps:$4 sm:$0xff]   ;;  %v4292_v31 = vld [vmem:[%s6281_s2 + $0x2ac] ss:$16 sps:$4 sm:$0xff]   ;;  %v4287_v33 = vld [vmem:[%s6281_s2 + $0x2c0] ss:$16 sps:$4 sm:$0xff]  }
  0x20   :  { %1447 = vmatpush1.bf16.msra.mxu1 %v4197_v32  ;;  %1286 = vmatprep.subr.bf16.mxu0 %v4201_v34  ;;  %v5162_v32 = vld [vmem:[%s6279_s0 + $0x8] sm:$0xff]  ;;  %v4319_v52 = vld [vmem:[%s6281_s2 + $0x364] ss:$16 sps:$4 sm:$0xff]  }
  0x21   :  { %1448 = vmatprep.subr.bf16.mxu1 %v4205_v35  ;;  %v4290_v34 = vld [vmem:[%s6281_s2 + $0x2a8] ss:$16 sps:$4 sm:$0xff]   ;;  %v3640_v35 = vcombine.high %v5162_v32, %v5162_v32  ;;  %v4316_v49 = vld [vmem:[%s6281_s2 + $0x32c] ss:$16 sps:$4 sm:$0xff]  }
  0x23   :  { %1287 = vmatpush1.bf16.msra.mxu0 %v4206_v37  ;;  %v4298_v37 = vld [vmem:[%s6281_s2 + $0x2cc] ss:$16 sps:$4 sm:$0xff]  }
  0x24   :  { %1449 = vmatpush1.bf16.msra.mxu1 %v4203_v36  ;;  %1288 = vmatprep.subr.bf16.mxu0 %v4207_v38  ;;  %v4295_v36 = vld [vmem:[%s6281_s2 + $0x2e4] ss:$16 sps:$4 sm:$0xff]   ;;  %v4293_v38 = vld [vmem:[%s6281_s2 + $0x2e0] ss:$16 sps:$4 sm:$0xff]  }
  0x25   :  { %1450 = vmatprep.subr.bf16.mxu1 %v4211_v39  ;;  %v4296_v39 = vld [vmem:[%s6281_s2 + $0x2c8] ss:$16 sps:$4 sm:$0xff]  }
  0x27   :  { %1289 = vmatpush1.bf16.msra.mxu0 %v4212_v41  ;;  %v4304_v41 = vld [vmem:[%s6281_s2 + $0x2ec] ss:$16 sps:$4 sm:$0xff]  }
  0x28   :  { %1451 = vmatpush1.bf16.msra.mxu1 %v4209_v40  ;;  %1290 = vmatprep.subr.bf16.mxu0 %v4213_v42  ;;  %v4301_v40 = vld [vmem:[%s6281_s2 + $0x304] ss:$16 sps:$4 sm:$0xff]   ;;  %v4299_v42 = vld [vmem:[%s6281_s2 + $0x300] ss:$16 sps:$4 sm:$0xff]  }
  0x29   :  { %1452 = vmatprep.subr.bf16.mxu1 %v4217_v43  ;;  %v4302_v43 = vld [vmem:[%s6281_s2 + $0x2e8] ss:$16 sps:$4 sm:$0xff]  }
  0x2b   :  { %1291 = vmatpush1.bf16.msra.mxu0 %v4218_v45  ;;  %v4310_v45 = vld [vmem:[%s6281_s2 + $0x30c] ss:$16 sps:$4 sm:$0xff]  }
  0x2c   :  { %1453 = vmatpush1.bf16.msra.mxu1 %v4215_v44  ;;  %1292 = vmatprep.subr.bf16.mxu0 %v4219_v46  ;;  %v4307_v44 = vld [vmem:[%s6281_s2 + $0x324] ss:$16 sps:$4 sm:$0xff]   ;;  %v4305_v46 = vld [vmem:[%s6281_s2 + $0x320] ss:$16 sps:$4 sm:$0xff]  }
  0x2d   :  { %1454 = vmatprep.subr.bf16.mxu1 %v4223_v47  ;;  %v4308_v47 = vld [vmem:[%s6281_s2 + $0x308] ss:$16 sps:$4 sm:$0xff]  }
  0x2f   :  { %1293 = vmatpush1.bf16.msra.mxu0 %v4224_v50  ;;  %v4311_v50 = vld [vmem:[%s6281_s2 + $0x340] ss:$16 sps:$4 sm:$0xff]  }
  0x30   :  { %1455 = vmatpush1.bf16.msra.mxu1 %v4221_v48  ;;  %1294 = vmatprep.subr.bf16.mxu0 %v4225_v51  ;;  %v4313_v48 = vld [vmem:[%s6281_s2 + $0x344] ss:$16 sps:$4 sm:$0xff]   ;;  %v4314_v51 = vld [vmem:[%s6281_s2 + $0x328] ss:$16 sps:$4 sm:$0xff]  }
  0x31   :  { %1456 = vmatprep.subr.bf16.mxu1 %v4229_v53  ;;  %v4322_v53 = vld [vmem:[%s6281_s2 + $0x34c] ss:$16 sps:$4 sm:$0xff]  }
  0x33   :  { %1295 = vmatpush1.bf16.msra.mxu0 %v4230_v55  ;;  %v4320_v55 = vld [vmem:[%s6281_s2 + $0x348] ss:$16 sps:$4 sm:$0xff]  }
  0x34   :  { %1457 = vmatpush1.bf16.msra.mxu1 %v4227_v54  ;;  %1296 = vmatprep.subr.bf16.mxu0 %v4231_v56  ;;  %v4317_v54 = vld [vmem:[%s6281_s2 + $0x360] ss:$16 sps:$4 sm:$0xff]   ;;  %v4325_v56 = vld [vmem:[%s6281_s2 + $0x384] ss:$16 sps:$4 sm:$0xff]  }
  0x35   :  { %1458 = vmatprep.subr.bf16.mxu1 %v4235_v57  ;;  %v4328_v57 = vld [vmem:[%s6281_s2 + $0x36c] ss:$16 sps:$4 sm:$0xff]  }
  0x37   :  { %1297 = vmatpush1.bf16.msra.mxu0 %v4236_v59  ;;  %v4326_v59 = vld [vmem:[%s6281_s2 + $0x368] ss:$16 sps:$4 sm:$0xff]  }
  0x38   :  { %1459 = vmatpush1.bf16.msra.mxu1 %v4233_v58  ;;  %1298 = vmatprep.subr.bf16.mxu0 %v4237_v60  ;;  %v4323_v58 = vld [vmem:[%s6281_s2 + $0x380] ss:$16 sps:$4 sm:$0xff]   ;;  %v4331_v60 = vld [vmem:[%s6281_s2 + $0x3a4] ss:$16 sps:$4 sm:$0xff]  }
  0x39   :  { %1460 = vmatprep.subr.bf16.mxu1 %v4241_v61  ;;  %v4334_v61 = vld [vmem:[%s6281_s2 + $0x38c] ss:$16 sps:$4 sm:$0xff]  }
  0x3b   :  { %1299 = vmatpush1.bf16.msra.mxu0 %v4242_v63  ;;  %v4332_v63 = vld [vmem:[%s6281_s2 + $0x388] ss:$16 sps:$4 sm:$0xff]  }
  0x3c   :  { %1461 = vmatpush1.bf16.msra.mxu1 %v4239_v62  ;;  %1300 = vmatprep.subr.bf16.mxu0 %v4243_v0  ;;  %v4329_v62 = vld [vmem:[%s6281_s2 + $0x3a0] ss:$16 sps:$4 sm:$0xff]   ;;  %v4337_v0 = vld [vmem:[%s6281_s2 + $0x3c4] ss:$16 sps:$4 sm:$0xff]  }
  0x3d   :  { %1462 = vmatprep.subr.bf16.mxu1 %v4247_v1  ;;  %v4340_v1 = vld [vmem:[%s6281_s2 + $0x3ac] ss:$16 sps:$4 sm:$0xff]  }
  0x3f   :  { %1301 = vmatpush1.bf16.msra.mxu0 %v4248_v4  ;;  %v4338_v4 = vld [vmem:[%s6281_s2 + $0x3a8] ss:$16 sps:$4 sm:$0xff]  }
  0x40   :  { %1463 = vmatpush1.bf16.msra.mxu1 %v4245_v3  ;;  %1311 = vmatprep.subr.bf16.mxu0 %v4253_v5  ;;  %v4335_v3 = vld [vmem:[%s6281_s2 + $0x3c0] ss:$16 sps:$4 sm:$0xff]   ;;  %v4343_v5 = vld [vmem:[%s6281_s2 + $0x3e4] ss:$16 sps:$4 sm:$0xff]  }
  0x41   :  { %1464 = vmatprep.subr.bf16.mxu1 %v4256_v6  ;;  %v4346_v6 = vld [vmem:[%s6281_s2 + $0x3cc] ss:$16 sps:$4 sm:$0xff]  }
  0x42   :  { %1303 = vmatmul.mubr.bf16.vlgmr.msra.gmra.mrb[0].mxu0 %v3637_v7 }
  0x43   :  { %1312 = vmatpush1.bf16.msra.mxu0 %v4251_v8  ;;  %1343 = vmatprep.mubr.bf16.mxu0 %v3640_v35  ;;  %v4344_v8 = vld [vmem:[%s6281_s2 + $0x3c8] ss:$16 sps:$4 sm:$0xff]  }
  0x44   :  { %1465 = vmatpush1.bf16.msra.mxu1 %v4254_v9  ;;  %1313 = vmatprep.subr.bf16.mxu0 %v4259_v10  ;;  %v4351_v9 = vld [vmem:[%s6281_s2 + $0x404] ss:$16 sps:$4 sm:$0xff]   ;;  %v4354_v10 = vld [vmem:[%s6281_s2 + $0x3ec] ss:$16 sps:$4 sm:$0xff]  }
  0x45   :  { %1475 = vmatprep.subr.bf16.mxu1 %v4262_v11  ;;  %v3639_v11 = vcombine.low %v5162_v32, %v5162_v32  ;;  %v4381_v32 = vld [vmem:[%s6281_s2 + $0x4a4] ss:$16 sps:$4 sm:$0xff]  }
  0x47   :  { %1467 = vmatmul.mubr.bf16.vlgmr.msra.gmra.mrb[4].mxu1 %v3637_v7  ;;  %1314 = vmatpush1.bf16.msra.mxu0 %v4257_v12  ;;  %v4341_v7 = vld [vmem:[%s6281_s2 + $0x3e0] ss:$16 sps:$4 sm:$0xff]  }
  0x48   :  { %1476 = vmatpush1.bf16.msra.mxu1 %v4260_v13  ;;  %1315 = vmatprep.subr.bf16.mxu0 %v4265_v14  ;;  %v4349_v12 = vld [vmem:[%s6281_s2 + $0x400] ss:$16 sps:$4 sm:$0xff]   ;;  %v4352_v13 = vld [vmem:[%s6281_s2 + $0x3e8] ss:$16 sps:$4 sm:$0xff]   ;;  %v4357_v14 = vld [vmem:[%s6281_s2 + $0x424] ss:$16 sps:$4 sm:$0xff]  }
  0x49   :  { %1477 = vmatprep.subr.bf16.mxu1 %v4268_v15  ;;  %1507 = vmatprep.mubr.bf16.mxu1 %v3640_v35  ;;  %v4360_v15 = vld [vmem:[%s6281_s2 + $0x40c] ss:$16 sps:$4 sm:$0xff]   ;;  %v4382_v35 = vld [vmem:[%s6281_s2 + $0x488] ss:$16 sps:$4 sm:$0xff]  }
  0x4b   :  { %1316 = vmatpush1.bf16.msra.mxu0 %v4263_v16  ;;  %v5303_v16 = vld [vmem:[%s6279_s0 + $0x10] sm:$0xff] }
  0x4c   :  { %1478 = vmatpush1.bf16.msra.mxu1 %v4266_v17  ;;  %1317 = vmatprep.subr.bf16.mxu0 %v4271_v18  ;;  %v4355_v17 = vld [vmem:[%s6281_s2 + $0x420] ss:$16 sps:$4 sm:$0xff]   ;;  %v3642_v18 = vcombine.high %v5303_v16, %v5303_v16 }
  0x4d   :  { %1479 = vmatprep.subr.bf16.mxu1 %v4274_v19  ;;  %v4358_v19 = vld [vmem:[%s6281_s2 + $0x408] ss:$16 sps:$4 sm:$0xff]  }
  0x4f   :  { %1318 = vmatpush1.bf16.msra.mxu0 %v4269_v20  ;;  %v4363_v20 = vld [vmem:[%s6281_s2 + $0x444] ss:$16 sps:$4 sm:$0xff]  }
  0x50   :  { %1480 = vmatpush1.bf16.msra.mxu1 %v4272_v21  ;;  %1319 = vmatprep.subr.bf16.mxu0 %v4277_v22  ;;  %v4366_v21 = vld [vmem:[%s6281_s2 + $0x42c] ss:$16 sps:$4 sm:$0xff]   ;;  %v4361_v22 = vld [vmem:[%s6281_s2 + $0x440] ss:$16 sps:$4 sm:$0xff]  }
  0x51   :  { %1481 = vmatprep.subr.bf16.mxu1 %v4280_v23  ;;  %v4364_v23 = vld [vmem:[%s6281_s2 + $0x428] ss:$16 sps:$4 sm:$0xff]  }
  0x53   :  { %1320 = vmatpush1.bf16.msra.mxu0 %v4275_v24  ;;  %v4369_v24 = vld [vmem:[%s6281_s2 + $0x464] ss:$16 sps:$4 sm:$0xff]  }
  0x54   :  { %1482 = vmatpush1.bf16.msra.mxu1 %v4278_v25  ;;  %1321 = vmatprep.subr.bf16.mxu0 %v4283_v26  ;;  %v4372_v25 = vld [vmem:[%s6281_s2 + $0x44c] ss:$16 sps:$4 sm:$0xff]   ;;  %v4367_v26 = vld [vmem:[%s6281_s2 + $0x460] ss:$16 sps:$4 sm:$0xff]  }
  0x55   :  { %1483 = vmatprep.subr.bf16.mxu1 %v4286_v27  ;;  %v4370_v27 = vld [vmem:[%s6281_s2 + $0x448] ss:$16 sps:$4 sm:$0xff]  }
  0x57   :  { %1322 = vmatpush1.bf16.msra.mxu0 %v4281_v28  ;;  %v4375_v28 = vld [vmem:[%s6281_s2 + $0x484] ss:$16 sps:$4 sm:$0xff]  }
  0x58   :  { %1484 = vmatpush1.bf16.msra.mxu1 %v4284_v29  ;;  %1323 = vmatprep.subr.bf16.mxu0 %v4289_v30  ;;  %v4378_v29 = vld [vmem:[%s6281_s2 + $0x46c] ss:$16 sps:$4 sm:$0xff]   ;;  %v4373_v30 = vld [vmem:[%s6281_s2 + $0x480] ss:$16 sps:$4 sm:$0xff]  }
  0x59   :  { %1485 = vmatprep.subr.bf16.mxu1 %v4292_v31  ;;  %v4376_v31 = vld [vmem:[%s6281_s2 + $0x468] ss:$16 sps:$4 sm:$0xff]  }
  0x5b   :  { %1324 = vmatpush1.bf16.msra.mxu0 %v4287_v33  ;;  %v4384_v33 = vld [vmem:[%s6281_s2 + $0x48c] ss:$16 sps:$4 sm:$0xff]  }
  0x5c   :  { %1486 = vmatpush1.bf16.msra.mxu1 %v4290_v34  ;;  %1325 = vmatprep.subr.bf16.mxu0 %v4295_v36  ;;  %v4379_v34 = vld [vmem:[%s6281_s2 + $0x4a0] ss:$16 sps:$4 sm:$0xff]   ;;  %v4387_v36 = vld [vmem:[%s6281_s2 + $0x4c4] ss:$16 sps:$4 sm:$0xff]  }
  0x5d   :  { %1487 = vmatprep.subr.bf16.mxu1 %v4298_v37  ;;  %v4390_v37 = vld [vmem:[%s6281_s2 + $0x4ac] ss:$16 sps:$4 sm:$0xff]  }
  0x5f   :  { %1326 = vmatpush1.bf16.msra.mxu0 %v4293_v38  ;;  %v4385_v38 = vld [vmem:[%s6281_s2 + $0x4c0] ss:$16 sps:$4 sm:$0xff]  }
  0x60   :  { %1488 = vmatpush1.bf16.msra.mxu1 %v4296_v39  ;;  %1327 = vmatprep.subr.bf16.mxu0 %v4301_v40  ;;  %v4388_v39 = vld [vmem:[%s6281_s2 + $0x4a8] ss:$16 sps:$4 sm:$0xff]   ;;  %v4393_v40 = vld [vmem:[%s6281_s2 + $0x4e4] ss:$16 sps:$4 sm:$0xff]  }
  0x61   :  { %1489 = vmatprep.subr.bf16.mxu1 %v4304_v41  ;;  %v4396_v41 = vld [vmem:[%s6281_s2 + $0x4cc] ss:$16 sps:$4 sm:$0xff]  }
  0x63   :  { %1328 = vmatpush1.bf16.msra.mxu0 %v4299_v42  ;;  %v4391_v42 = vld [vmem:[%s6281_s2 + $0x4e0] ss:$16 sps:$4 sm:$0xff]  }
  0x64   :  { %1490 = vmatpush1.bf16.msra.mxu1 %v4302_v43  ;;  %1329 = vmatprep.subr.bf16.mxu0 %v4307_v44  ;;  %v4394_v43 = vld [vmem:[%s6281_s2 + $0x4c8] ss:$16 sps:$4 sm:$0xff]   ;;  %v4399_v44 = vld [vmem:[%s6281_s2 + $0x504] ss:$16 sps:$4 sm:$0xff]  }
  0x65   :  { %1491 = vmatprep.subr.bf16.mxu1 %v4310_v45  ;;  %v4402_v45 = vld [vmem:[%s6281_s2 + $0x4ec] ss:$16 sps:$4 sm:$0xff]  }
  0x67   :  { %1330 = vmatpush1.bf16.msra.mxu0 %v4305_v46  ;;  %v4397_v46 = vld [vmem:[%s6281_s2 + $0x500] ss:$16 sps:$4 sm:$0xff]  }
  0x68   :  { %1492 = vmatpush1.bf16.msra.mxu1 %v4308_v47  ;;  %1331 = vmatprep.subr.bf16.mxu0 %v4313_v48  ;;  %v4400_v47 = vld [vmem:[%s6281_s2 + $0x4e8] ss:$16 sps:$4 sm:$0xff]   ;;  %v4405_v48 = vld [vmem:[%s6281_s2 + $0x524] ss:$16 sps:$4 sm:$0xff]  }
  0x69   :  { %1493 = vmatprep.subr.bf16.mxu1 %v4316_v49  ;;  %v4408_v49 = vld [vmem:[%s6281_s2 + $0x50c] ss:$16 sps:$4 sm:$0xff]  }
  0x6b   :  { %1332 = vmatpush1.bf16.msra.mxu0 %v4311_v50  ;;  %v4403_v50 = vld [vmem:[%s6281_s2 + $0x520] ss:$16 sps:$4 sm:$0xff]  }
  0x6c   :  { %1494 = vmatpush1.bf16.msra.mxu1 %v4314_v51  ;;  %1333 = vmatprep.subr.bf16.mxu0 %v4319_v52  ;;  %v4406_v51 = vld [vmem:[%s6281_s2 + $0x508] ss:$16 sps:$4 sm:$0xff]   ;;  %v4411_v52 = vld [vmem:[%s6281_s2 + $0x544] ss:$16 sps:$4 sm:$0xff]  }
  0x6d   :  { %1495 = vmatprep.subr.bf16.mxu1 %v4322_v53  ;;  %v4414_v53 = vld [vmem:[%s6281_s2 + $0x52c] ss:$16 sps:$4 sm:$0xff]  }
  0x6f   :  { %1334 = vmatpush1.bf16.msra.mxu0 %v4317_v54  ;;  %v4409_v54 = vld [vmem:[%s6281_s2 + $0x540] ss:$16 sps:$4 sm:$0xff]  }
  0x70   :  { %1496 = vmatpush1.bf16.msra.mxu1 %v4320_v55  ;;  %1335 = vmatprep.subr.bf16.mxu0 %v4325_v56  ;;  %v4412_v55 = vld [vmem:[%s6281_s2 + $0x528] ss:$16 sps:$4 sm:$0xff]   ;;  %v4417_v56 = vld [vmem:[%s6281_s2 + $0x564] ss:$16 sps:$4 sm:$0xff]  }
  0x71   :  { %1497 = vmatprep.subr.bf16.mxu1 %v4328_v57  ;;  %v4420_v57 = vld [vmem:[%s6281_s2 + $0x54c] ss:$16 sps:$4 sm:$0xff]  }
  0x73   :  { %1336 = vmatpush1.bf16.msra.mxu0 %v4323_v58  ;;  %v4415_v58 = vld [vmem:[%s6281_s2 + $0x560] ss:$16 sps:$4 sm:$0xff]  }
  0x74   :  { %1498 = vmatpush1.bf16.msra.mxu1 %v4326_v59  ;;  %1337 = vmatprep.subr.bf16.mxu0 %v4331_v60  ;;  %v4418_v59 = vld [vmem:[%s6281_s2 + $0x548] ss:$16 sps:$4 sm:$0xff]   ;;  %v4423_v60 = vld [vmem:[%s6281_s2 + $0x584] ss:$16 sps:$4 sm:$0xff]  }
  0x75   :  { %1499 = vmatprep.subr.bf16.mxu1 %v4334_v61  ;;  %v4426_v61 = vld [vmem:[%s6281_s2 + $0x56c] ss:$16 sps:$4 sm:$0xff]  }
  0x77   :  { %1338 = vmatpush1.bf16.msra.mxu0 %v4329_v62  ;;  %v4421_v62 = vld [vmem:[%s6281_s2 + $0x580] ss:$16 sps:$4 sm:$0xff]  }
  0x78   :  { %1500 = vmatpush1.bf16.msra.mxu1 %v4332_v63  ;;  %1339 = vmatprep.subr.bf16.mxu0 %v4337_v0  ;;  %v4424_v63 = vld [vmem:[%s6281_s2 + $0x568] ss:$16 sps:$4 sm:$0xff]   ;;  %v4429_v0 = vld [vmem:[%s6281_s2 + $0x5a4] ss:$16 sps:$4 sm:$0xff]  }
  0x79   :  { %1501 = vmatprep.subr.bf16.mxu1 %v4340_v1  ;;  %v4432_v1 = vld [vmem:[%s6281_s2 + $0x58c] ss:$16 sps:$4 sm:$0xff]  }
  0x7b   :  { %1340 = vmatpush1.bf16.msra.mxu0 %v4335_v3  ;;  %v4427_v3 = vld [vmem:[%s6281_s2 + $0x5a0] ss:$16 sps:$4 sm:$0xff]  }
  0x7c   :  { %1502 = vmatpush1.bf16.msra.mxu1 %v4338_v4  ;;  %1341 = vmatprep.subr.bf16.mxu0 %v4343_v5  ;;  %v4430_v4 = vld [vmem:[%s6281_s2 + $0x588] ss:$16 sps:$4 sm:$0xff]   ;;  %v4435_v5 = vld [vmem:[%s6281_s2 + $0x5c4] ss:$16 sps:$4 sm:$0xff]  }
  0x7d   :  { %1503 = vmatprep.subr.bf16.mxu1 %v4346_v6  ;;  %v4438_v6 = vld [vmem:[%s6281_s2 + $0x5ac] ss:$16 sps:$4 sm:$0xff]  }
  0x7f   :  { %1342 = vmatpush1.bf16.msra.mxu0 %v4341_v7  ;;  %v4433_v7 = vld [vmem:[%s6281_s2 + $0x5c0] ss:$16 sps:$4 sm:$0xff]  }
  0x80   :  { %1504 = vmatpush1.bf16.msra.mxu1 %v4344_v8  ;;  %1352 = vmatprep.subr.bf16.mxu0 %v4351_v9  ;;  %v4436_v8 = vld [vmem:[%s6281_s2 + $0x5a8] ss:$16 sps:$4 sm:$0xff]   ;;  %v4441_v9 = vld [vmem:[%s6281_s2 + $0x5e4] ss:$16 sps:$4 sm:$0xff]  }
  0x81   :  { %1505 = vmatprep.subr.bf16.mxu1 %v4354_v10  ;;  %v4444_v10 = vld [vmem:[%s6281_s2 + $0x5cc] ss:$16 sps:$4 sm:$0xff]  }
  0x82   :  { %1344 = vmatmul.mubr.bf16.vlgmr.msra.gmra.mrb[0].mxu0 %v3639_v11 }
  0x83   :  { %1353 = vmatpush1.bf16.msra.mxu0 %v4349_v12  ;;  %1384 = vmatprep.mubr.bf16.mxu0 %v3642_v18  ;;  %v4442_v12 = vld [vmem:[%s6281_s2 + $0x5c8] ss:$16 sps:$4 sm:$0xff]  }
  0x84   :  { %1506 = vmatpush1.bf16.msra.mxu1 %v4352_v13  ;;  %1354 = vmatprep.subr.bf16.mxu0 %v4357_v14  ;;  %v4449_v13 = vld [vmem:[%s6281_s2 + $0x5ec] ss:$16 sps:$4 sm:$0xff]   ;;  %v4453_v14 = vld [vmem:[%s6283_s4 + $0x40] sm:$0xff]  }
  0x85   :  { %1516 = vmatprep.subr.bf16.mxu1 %v4360_v15  ;;  %v4447_v15 = vld [vmem:[%s6281_s2 + $0x5e8] ss:$16 sps:$4 sm:$0xff]  }
  0x87   :  { %1508 = vmatmul.mubr.bf16.vlgmr.msra.gmra.mrb[4].mxu1 %v3639_v11  ;;  %1355 = vmatpush1.bf16.msra.mxu0 %v4355_v17  ;;  %v4439_v11 = vld [vmem:[%s6281_s2 + $0x5e0] ss:$16 sps:$4 sm:$0xff]  }
  0x88   :  { %1517 = vmatpush1.bf16.msra.mxu1 %v4358_v19  ;;  %1356 = vmatprep.subr.bf16.mxu0 %v4363_v20  ;;  %v4454_v17 = vld [vmem:[%s6283_s4] sm:$0xff]   ;;  %v4452_v19 = vld [vmem:[%s6281_s2 + $0x60c] ss:$16 sps:$4 sm:$0xff]  }
  0x89   :  { %1518 = vmatprep.subr.bf16.mxu1 %v4366_v21  ;;  %1548 = vmatprep.mubr.bf16.mxu1 %v3642_v18  ;;  %v3641_v18 = vcombine.low %v5303_v16, %v5303_v16  ;;  %v4455_v20 = vld [vmem:[%s6283_s4 + $0x48] sm:$0xff]  }
  0x8a   :  { %v4450_v21 = vld [vmem:[%s6281_s2 + $0x608] ss:$16 sps:$4 sm:$0xff]  }
  0x8b   :  { %1357 = vmatpush1.bf16.msra.mxu0 %v4361_v22  ;;  %v4456_v16 = vld [vmem:[%s6283_s4 + $0x8] sm:$0xff]   ;;  %v4457_v22 = vld [vmem:[%s6283_s4 + $0x50] sm:$0xff]  }
  0x8c   :  { %1519 = vmatpush1.bf16.msra.mxu1 %v4364_v23  ;;  %1358 = vmatprep.subr.bf16.mxu0 %v4369_v24  ;;  %v4458_v23 = vld [vmem:[%s6283_s4 + $0x10] sm:$0xff]   ;;  %v4460_v24 = vld [vmem:[%s6283_s4 + $0x58] sm:$0xff]  }
  0x8d   :  { %1520 = vmatprep.subr.bf16.mxu1 %v4372_v25  ;;  %v4461_v25 = vld [vmem:[%s6283_s4 + $0x18] sm:$0xff]  }
  0x8f   :  { %1359 = vmatpush1.bf16.msra.mxu0 %v4367_v26  ;;  %v4463_v26 = vld [vmem:[%s6283_s4 + $0x60] sm:$0xff]  }
  0x90   :  { %1521 = vmatpush1.bf16.msra.mxu1 %v4370_v27  ;;  %1360 = vmatprep.subr.bf16.mxu0 %v4375_v28  ;;  %v4459_v27 = vld [vmem:[%s6283_s4 + $0x80] sm:$0xff]  }
  0x91   :  { %1522 = vmatprep.subr.bf16.mxu1 %v4378_v29  ;;  %v4464_v28 = vld [vmem:[%s6283_s4 + $0x20] sm:$0xff]   ;;  %v4466_v29 = vld [vmem:[%s6283_s4 + $0x68] sm:$0xff]  }
  0x93   :  { %1361 = vmatpush1.bf16.msra.mxu0 %v4373_v30  ;;  %v4462_v30 = vld [vmem:[%s6283_s4 + $0x88] sm:$0xff]  }
  0x94   :  { %1523 = vmatpush1.bf16.msra.mxu1 %v4376_v31  ;;  %1362 = vmatprep.subr.bf16.mxu0 %v4381_v32  ;;  %v4768_v31 = vld [vmem:[%s6279_s0 + $0x18] ss:$0 sps:$4 sm:$0xff]   ;;  %v4465_v32 = vld [vmem:[%s6283_s4 + $0x90] sm:$0xff]  }
  0x95   :  { %1524 = vmatprep.subr.bf16.mxu1 %v4384_v33 }
  0x97   :  { %1363 = vmatpush1.bf16.msra.mxu0 %v4379_v34 }
  0x98   :  { %1525 = vmatpush1.bf16.msra.mxu1 %v4382_v35  ;;  %1364 = vmatprep.subr.bf16.mxu0 %v4387_v36 }
  0x99   :  { %1526 = vmatprep.subr.bf16.mxu1 %v4390_v37 }
  0x9b   :  { %1365 = vmatpush1.bf16.msra.mxu0 %v4385_v38 }
  0x9c   :  { %1527 = vmatpush1.bf16.msra.mxu1 %v4388_v39  ;;  %1366 = vmatprep.subr.bf16.mxu0 %v4393_v40 }
  0x9d   :  { %1528 = vmatprep.subr.bf16.mxu1 %v4396_v41 }
  0x9f   :  { %1367 = vmatpush1.bf16.msra.mxu0 %v4391_v42 }
  0xa0   :  { %1529 = vmatpush1.bf16.msra.mxu1 %v4394_v43  ;;  %1368 = vmatprep.subr.bf16.mxu0 %v4399_v44 }
  0xa1   :  { %1530 = vmatprep.subr.bf16.mxu1 %v4402_v45 }
  0xa3   :  { %1369 = vmatpush1.bf16.msra.mxu0 %v4397_v46 }
  0xa4   :  { %1531 = vmatpush1.bf16.msra.mxu1 %v4400_v47  ;;  %1370 = vmatprep.subr.bf16.mxu0 %v4405_v48 }
  0xa5   :  { %1532 = vmatprep.subr.bf16.mxu1 %v4408_v49 }
  0xa7   :  { %1371 = vmatpush1.bf16.msra.mxu0 %v4403_v50 }
  0xa8   :  { %1533 = vmatpush1.bf16.msra.mxu1 %v4406_v51  ;;  %1372 = vmatprep.subr.bf16.mxu0 %v4411_v52 }
  0xa9   :  { %1534 = vmatprep.subr.bf16.mxu1 %v4414_v53 }
  0xab   :  { %1373 = vmatpush1.bf16.msra.mxu0 %v4409_v54 }
  0xac   :  { %1535 = vmatpush1.bf16.msra.mxu1 %v4412_v55  ;;  %1374 = vmatprep.subr.bf16.mxu0 %v4417_v56 }
  0xad   :  { %1536 = vmatprep.subr.bf16.mxu1 %v4420_v57 }
  0xaf   :  { %1375 = vmatpush1.bf16.msra.mxu0 %v4415_v58 }
  0xb0   :  { %1537 = vmatpush1.bf16.msra.mxu1 %v4418_v59  ;;  %1376 = vmatprep.subr.bf16.mxu0 %v4423_v60 }
  0xb1   :  { %1538 = vmatprep.subr.bf16.mxu1 %v4426_v61 }
  0xb3   :  { %1377 = vmatpush1.bf16.msra.mxu0 %v4421_v62 }
  0xb4   :  { %1539 = vmatpush1.bf16.msra.mxu1 %v4424_v63  ;;  %1378 = vmatprep.subr.bf16.mxu0 %v4429_v0 }
  0xb5   :  { %1540 = vmatprep.subr.bf16.mxu1 %v4432_v1 }
  0xb7   :  { %1379 = vmatpush1.bf16.msra.mxu0 %v4427_v3 }
  0xb8   :  { %1541 = vmatpush1.bf16.msra.mxu1 %v4430_v4  ;;  %1380 = vmatprep.subr.bf16.mxu0 %v4435_v5 }
  0xb9   :  { %1542 = vmatprep.subr.bf16.mxu1 %v4438_v6 }
  0xbb   :  { %1381 = vmatpush1.bf16.msra.mxu0 %v4433_v7 }
  0xbc   :  { %1543 = vmatpush1.bf16.msra.mxu1 %v4436_v8  ;;  %1382 = vmatprep.subr.bf16.mxu0 %v4441_v9 }
  0xbd   :  { %1544 = vmatprep.subr.bf16.mxu1 %v4444_v10 }
  0xbf   :  { %1383 = vmatpush1.bf16.msra.mxu0 %v4439_v11 }
  0xc0   :  { %1545 = vmatpush1.bf16.msra.mxu1 %v4442_v12  ;;  %4060 = vmatprep.subr.bf16.mxu0 %v4453_v14 }
  0xc1   :  { %1546 = vmatprep.subr.bf16.mxu1 %v4449_v13 }
  0xc2   :  { %1385 = vmatmul.mubr.bf16.vlgmr.msra.gmra.mrb[0].mxu0 %v3641_v18 }
  0xc3   :  { %4061 = vmatpush3.bf16.msra.mxu0 %v4454_v17 }
  0xc4   :  { %1547 = vmatpush1.bf16.msra.mxu1 %v4447_v15  ;;  %4062 = vmatprep.subr.bf16.mxu0 %v4455_v20 }
  0xc5   :  { %1557 = vmatprep.subr.bf16.mxu1 %v4452_v19 }
  0xc7   :  { %1549 = vmatmul.mubr.bf16.vlgmr.msra.gmra.mrb[4].mxu1 %v3641_v18  ;;  %4063 = vmatpush3.bf16.msra.mxu0 %v4456_v16 }
  0xc8   :  { %1558 = vmatpush1.bf16.msra.mxu1 %v4450_v21  ;;  %1589 = vmatprep.mubr.bf16.mxu1 %v4817_v2 }
  0xc9   :  { %1856 = vmatprep.subr.bf16.mxu1 %v4817_v2  ;;  %4064 = vmatprep.subr.bf16.mxu0 %v4457_v22 }
  0xcb   :  { %4065 = vmatpush3.bf16.msra.mxu0 %v4458_v23 }
  0xcc   :  { %4066 = vmatprep.subr.bf16.mxu0 %v4460_v24 }
  0xcf   :  { %4067 = vmatpush3.bf16.msra.mxu0 %v4461_v25 }
  0xd0   :  { %4068 = vmatprep.subr.bf16.mxu0 %v4463_v26 }
  0xd3   :  { %3841 = vmatmul.mubr.msk.bf16.vlgmr.msra.gmra.mrb[4].mxu1 %vm1266_vm0, %v4768_v31  ;;  %4069 = vmatpush3.bf16.msra.mxu0 %v4464_v28 }
  0xd4   :  { %1857 = vmatpush1.bf16.msra.mxu1 %v4459_v27  ;;  %4070 = vmatprep.subr.bf16.mxu0 %v4466_v29 }
  0xd5   :  { %1858 = vmatprep.subr.bf16.mxu1 %v4817_v2 }
  0xd8   :  { %1859 = vmatpush1.bf16.msra.mxu1 %v4462_v30 }
  0xd9   :  { %1860 = vmatprep.subr.bf16.mxu1 %v4817_v2 }
  0xda   :  { %v1427_v33 = vpop.f32.mrb[0].mxu1 }
  0xdb   :  { %v1429_v34 = vpop.f32.mrb[1].mxu1 }
  0xdc   :  { %v1431_v35 = vpop.f32.mrb[2].mxu1  ;;  %1861 = vmatpush1.bf16.msra.mxu1 %v4465_v32 }
  0xdd   :  { %v1432_v36 = vpop.f32.mrb[3].mxu1  ;;  %1862 = vmatprep.subr.bf16.mxu1 %v4817_v2 }
  0xde   :  { %18 = vsyncpa [#allocation5], 0  ;;  %v4467_v37 = vld [vmem:[%s6283_s4 + $0x28] sm:$0xff]   ;;  %v4468_v38 = vld [vmem:[%s6283_s4 + $0x98] sm:$0xff]   ;;  %v242_v48 = vlaneseq  ;;  %vm1969_vm1 = vcmask 1041408   ;;  %s4818_s17 = smov 108  }
  0xdf   :  { %4071 = vmatpush3.bf16.msra.mxu0 %v4467_v37  ;;  %v4469_v39 = vld [vmem:[%s6283_s4 + $0x70] sm:$0xff]   ;;  %v4471_v41 = vld [vmem:[%s6283_s4 + $0xa0] sm:$0xff]   ;;  %v4472_v42 = vld [vmem:[%s6283_s4 + $0x78] sm:$0xff]   ;;  %vm1965_vm2 = vcmask 162816  }
  0xe0   :  { %1863 = vmatpush1.bf16.msra.mxu1 %v4468_v38  ;;  %v4470_v40 = vld [vmem:[%s6283_s4 + $0x30] sm:$0xff]   ;;  %4072 = vmatprep.subr.bf16.mxu0 %v4469_v39  ;;  %v4473_v43 = vld [vmem:[%s6283_s4 + $0x38] sm:$0xff]   ;;  %v4474_v44 = vld [vmem:[%s6283_s4 + $0xa8] sm:$0xff]   ;;  %v5584_v49 = vshrl.u32 %v242_v48, 7 }
  0xe1   :  { %1864 = vmatprep.subr.bf16.mxu1 %v4817_v2  ;;  %v4475_v45 = vld [vmem:[%s6283_s4 + $0xb0] sm:$0xff]   ;;  %v4476_v46 = vld [vmem:[%s6283_s4 + $0xb8] sm:$0xff]   ;;  %v4477_v47 = vld [vmem:[%s6283_s4 + $0xc0] sm:$0xff]  }
  0xe2   :  { %v5587_v50 = vsub.s32 0, %v5584_v49  ;;  %v240_v51 = vld [vmem:[%s6282_s3] sm:$0xf]  ;;  %v5593_v52 = vsub.s32 1, %v5584_v49  ;;  %v5598_v4 = vsub.s32 2, %v5584_v49  ;;  %v5601_v5 = vsub.s32 3, %v5584_v49 }
  0xe3   :  { %4073 = vmatpush3.bf16.msra.mxu0 %v4470_v40  ;;  %v4478_v19 = vld [vmem:[%s6285_s6] ss:$16 sps:$4 sm:$0xff]   ;;  %v4480_v20 = vld [vmem:[%s6285_s6 + $0x4] ss:$16 sps:$4 sm:$0xff]   ;;  %v4485_v38 = vld [vmem:[%s6285_s6 + $0xc] ss:$16 sps:$4 sm:$0xff]  }
  0xe4   :  { %1865 = vmatpush1.bf16.msra.mxu1 %v4471_v41  ;;  %4074 = vmatprep.subr.bf16.mxu0 %v4472_v42  ;;  %v245_v53 = vrot.slane %v240_v51, %v5587_v50  ;;  %v249_v54 = vrot.slane %v240_v51, %v5593_v52  ;;  %v253_v6 = vrot.slane %v240_v51, %v5598_v4  ;;  %v3842_v25 = vld [vmem:[%s6284_s5] ss:$0 sm:$0xff]  ;;  %v4496_v42 = vld [vmem:[%s6287_s8 + $0x3c] ss:$28 sps:$4 sm:$0xff]  }
  0xe5   :  { %1866 = vmatprep.subr.bf16.mxu1 %v4817_v2  ;;  %v257_v7 = vrot.slane %v240_v51, %v5601_v5  ;;  %v4488_v40 = vld [vmem:[%s6287_s8] ss:$28 sps:$4 sm:$0xff]  }
  0xe6   :  { %v4490_v41 = vld [vmem:[%s6287_s8 + $0x4] ss:$28 sps:$4 sm:$0xff]  }
  0xe7   :  { %4075 = vmatpush3.bf16.msra.mxu0 %v4473_v43  ;;  %v4494_v43 = vld [vmem:[%s6287_s8 + $0x38] ss:$28 sps:$4 sm:$0xff]   ;;  %v4514_v48 = vld [vmem:[%s6287_s8 + $0xe4] ss:$28 sps:$4 sm:$0xff]  }
  0xe8   :  { %1867 = vmatpush1.bf16.msra.mxu1 %v4474_v44  ;;  %3212 = vmatprep.subr.bf16.mxu0 %v4490_v41  ;;  %v4502_v44 = vld [vmem:[%s6287_s8 + $0x74] ss:$28 sps:$4 sm:$0xff]   ;;  %v4512_v51 = vld [vmem:[%s6287_s8 + $0xe0] ss:$28 sps:$4 sm:$0xff]  }
  0xe9   :  { %1868 = vmatprep.subr.bf16.mxu1 %v4817_v2  ;;  %v4551_v41 = vld [vmem:[%s6287_s8 + $0x238] ss:$28 sps:$4 sm:$0xff]  }
  0xec   :  { %1869 = vmatpush1.bf16.msra.mxu1 %v4475_v45  ;;  %v4500_v45 = vld [vmem:[%s6287_s8 + $0x70] ss:$28 sps:$4 sm:$0xff]  }
  0xed   :  { %1870 = vmatprep.subr.bf16.mxu1 %v4817_v2 }
  0xf0   :  { %1871 = vmatpush1.bf16.msra.mxu1 %v4476_v46  ;;  %v4508_v46 = vld [vmem:[%s6287_s8 + $0xac] ss:$28 sps:$4 sm:$0xff]  }
  0xf1   :  { %1872 = vmatprep.subr.bf16.mxu1 %v4817_v2 }
  0xf4   :  { %1873 = vmatpush1.bf16.msra.mxu1 %v4477_v47  ;;  %v4506_v47 = vld [vmem:[%s6287_s8 + $0xa8] ss:$28 sps:$4 sm:$0xff]  }
  0xf5   :  { %1982 = vmatprep.subr.bf16.mxu1 %v4480_v20 }
 0x195   :  { %v1386_v55 = vpop.f32.mrb[0].mxu0 }
 0x196   :  { %v4104_v56 = vadd.f32 %v1386_v55, %v245_v53  ;;  %v1388_v57 = vpop.f32.mrb[1].mxu0  ;;  %v4520_v53 = vld [vmem:[%s6287_s8 + $0x11c] ss:$28 sps:$4 sm:$0xff]   ;;  %v4526_v55 = vld [vmem:[%s6287_s8 + $0x154] ss:$28 sps:$4 sm:$0xff]  }
 0x197   :  { %v4106_v58 = vadd.f32 %v1388_v57, %v249_v54  ;;  %v1390_v59 = vpop.f32.mrb[2].mxu0  ;;  %v4518_v54 = vld [vmem:[%s6287_s8 + $0x118] ss:$28 sps:$4 sm:$0xff]   ;;  %v4532_v57 = vld [vmem:[%s6287_s8 + $0x18c] ss:$28 sps:$4 sm:$0xff]  }
 0x198   :  { %v4105_v60 = vadd.f32 %v4104_v56, %v1427_v33  ;;  %v1391_v61 = vpop.f32.mrb[3].mxu0  ;;  %v1911_v33 = vld [vmem:[%s6285_s6 + $0x20] sm:$0x33]  ;;  %v4524_v56 = vld [vmem:[%s6287_s8 + $0x150] ss:$28 sps:$4 sm:$0xff]  }
 0x199   :  { %v4107_v62 = vadd.f32 %v4106_v58, %v1429_v34  ;;  %v3874_v35 = vcombine.high %v1911_v33, %v1911_v33  ;;  %v3873_v36 = vcombine.low %v1911_v33, %v1911_v33  ;;  %v4530_v58 = vld [vmem:[%s6287_s8 + $0x188] ss:$28 sps:$4 sm:$0xff]   ;;  %v4544_v61 = vld [vmem:[%s6287_s8 + $0x1fc] ss:$28 sps:$4 sm:$0xff]  }
 0x19a   :  { %v1598_v63 = vmax.f32 %v4105_v60, 0.0  ;;  %v4538_v59 = vld [vmem:[%s6287_s8 + $0x1c4] ss:$28 sps:$4 sm:$0xff]   ;;  %v4527_v33 = vld [vmem:[%s6287_s8 + $0x158] ss:$28 sps:$4 sm:$0xff]  }
 0x19b   :  { %v1599_v0 = vmax.f32 %v4107_v62, 0.0  ;;  %v1971_v37 = vsel %vm1969_vm1, %v3873_v36, 0  ;;  %v4536_v60 = vld [vmem:[%s6287_s8 + $0x1c0] ss:$28 sps:$4 sm:$0xff]   ;;  %v4542_v62 = vld [vmem:[%s6287_s8 + $0x1f8] ss:$28 sps:$4 sm:$0xff]  }
 0x19c   :  { %v1602_v3 = vpack.c.bf16 %v1598_v63, %v1598_v63  ;;  %v4550_v63 = vld [vmem:[%s6287_s8 + $0x234] ss:$28 sps:$4 sm:$0xff]   ;;  %v4541_v36 = vld [vmem:[%s6287_s8 + $0x1cc] ss:$28 sps:$4 sm:$0xff]  }
 0x19d   :  { %v1603_v1 = vpack.c.bf16 %v1599_v0, %v1599_v0  ;;  %v4548_v0 = vld [vmem:[%s6287_s8 + $0x230] ss:$28 sps:$4 sm:$0xff]  }
 0x19f   :  { %1848 = vmatprep.mubr.bf16.mxu0 %v1603_v1  ;;  %v4556_v1 = vld [vmem:[%s6287_s8 + $0x26c] ss:$28 sps:$4 sm:$0xff]  }
 0x1a0   :  { %1849 = vmatmul.mubr.bf16.vlgmr.msra.gmra.mrb[4].mxu0 %v1602_v3  ;;  %v4554_v3 = vld [vmem:[%s6287_s8 + $0x268] ss:$28 sps:$4 sm:$0xff]  }
 0x1a1   :  { %3213 = vmatpush1.bf16.msra.mxu0 %v4488_v40  ;;  %v4553_v40 = vld [vmem:[%s6287_s8 + $0x23c] ss:$28 sps:$4 sm:$0xff]  }
 0x1a2   :  { %3214 = vmatprep.subr.bf16.mxu0 %v4496_v42  ;;  %v4559_v42 = vld [vmem:[%s6287_s8 + $0x274] ss:$28 sps:$4 sm:$0xff]  }
 0x1a5   :  { %3215 = vmatpush1.bf16.msra.mxu0 %v4494_v43  ;;  %v4557_v43 = vld [vmem:[%s6287_s8 + $0x270] ss:$28 sps:$4 sm:$0xff]  }
 0x1a6   :  { %v1591_v8 = vpop.f32.mrb[4].mxu1  ;;  %3216 = vmatprep.subr.bf16.mxu0 %v4502_v44  ;;  %v4565_v44 = vld [vmem:[%s6287_s8 + $0x2ac] ss:$28 sps:$4 sm:$0xff]  }
 0x1a7   :  { %v4108_v9 = vadd.f32 %v1591_v8, %v253_v6  ;;  %v1593_v10 = vpop.f32.mrb[5].mxu1  ;;  %v4562_v6 = vld [vmem:[%s6287_s8 + $0x2a4] ss:$28 sps:$4 sm:$0xff]   ;;  %v4568_v8 = vld [vmem:[%s6287_s8 + $0x2dc] ss:$28 sps:$4 sm:$0xff]  }
 0x1a8   :  { %v4109_v11 = vadd.f32 %v1593_v10, %v257_v7  ;;  %v1595_v12 = vpop.f32.mrb[6].mxu1  ;;  %v4560_v7 = vld [vmem:[%s6287_s8 + $0x2a0] ss:$28 sps:$4 sm:$0xff]  }
 0x1a9   :  { %v1600_v13 = vmax.f32 %v4108_v9, 0.0  ;;  %v1596_v14 = vpop.f32.mrb[7].mxu1  ;;  %3217 = vmatpush1.bf16.msra.mxu0 %v4500_v45  ;;  %v4566_v9 = vld [vmem:[%s6287_s8 + $0x2d8] ss:$28 sps:$4 sm:$0xff]   ;;  %v1896_v10 = vld [vmem:[%s6280_s1] sm:$0xff] }
 0x1aa   :  { %v1601_v15 = vmax.f32 %v4109_v11, 0.0  ;;  %3218 = vmatprep.subr.bf16.mxu0 %v4508_v46  ;;  %v4563_v45 = vld [vmem:[%s6287_s8 + $0x2a8] ss:$28 sps:$4 sm:$0xff]  }
 0x1ab   :  { %v1604_v18 = vpack.c.bf16 %v1600_v13, %v1600_v13  ;;  %v1912_v13 = vld [vmem:[%s6285_s6 + $0x28] sm:$0x33]  ;;  %v4571_v46 = vld [vmem:[%s6287_s8 + $0x2e4] ss:$28 sps:$4 sm:$0xff]  }
 0x1ac   :  { %v1605_v17 = vpack.c.bf16 %v1601_v15, %v1601_v15  ;;  %v4483_v15 = vld [vmem:[%s6285_s6 + $0x8] ss:$16 sps:$4 sm:$0xff]  }
 0x1ad   :  { %3219 = vmatpush1.bf16.msra.mxu0 %v4506_v47  ;;  %v4569_v47 = vld [vmem:[%s6287_s8 + $0x2e0] ss:$28 sps:$4 sm:$0xff]  }
 0x1ae   :  { %3868 = vmatprep.mubr.msk.bf16.mxu1 %vm1266_vm0, %v1605_v17  ;;  %3220 = vmatprep.subr.bf16.mxu0 %v4514_v48  ;;  %v4574_v48 = vld [vmem:[%s6287_s8 + $0x314] ss:$28 sps:$4 sm:$0xff]  }
 0x1af   :  { %1889 = vmatmul.mubr.bf16.vlgmr.msra.gmra.mrb[8].mxu1 %v1604_v18  ;;  %v3876_v18 = vcombine.high %v1912_v13, %v1912_v13 }
 0x1b0   :  { %2014 = vmatprep.mubr.bf16.mxu1 %v4817_v2  ;;  %1983 = vmatpush1.bf16.msra.mxu1 %v4478_v19  ;;  %v3875_v19 = vcombine.low %v1912_v13, %v1912_v13  ;;  %v4587_v13 = vld [vmem:[%s6287_s8 + $0x388] ss:$28 sps:$4 sm:$0xff]  }
 0x1b1   :  { %3877 = vmatprep.subr.msk.bf16.mxu1 %vm1969_vm1, %v3874_v35  ;;  %3221 = vmatpush1.bf16.msra.mxu0 %v4512_v51  ;;  %v4533_v35 = vld [vmem:[%s6287_s8 + $0x190] ss:$28 sps:$4 sm:$0xff]   ;;  %v4577_v51 = vld [vmem:[%s6287_s8 + $0x31c] ss:$28 sps:$4 sm:$0xff]  }
 0x1b2   :  { %3222 = vmatprep.subr.bf16.mxu0 %v4520_v53  ;;  %v1977_v20 = vsel %vm1969_vm1, %v3875_v19, 0  ;;  %v4572_v53 = vld [vmem:[%s6287_s8 + $0x310] ss:$28 sps:$4 sm:$0xff]  }
 0x1b4   :  { %1985 = vmatpush1.bf16.msra.mxu1 %v1971_v37  ;;  %v4539_v37 = vld [vmem:[%s6287_s8 + $0x1c8] ss:$28 sps:$4 sm:$0xff]  }
 0x1b5   :  { %2023 = vmatprep.subr.bf16.mxu1 %v4485_v38  ;;  %3223 = vmatpush1.bf16.msra.mxu0 %v4518_v54  ;;  %v4547_v38 = vld [vmem:[%s6287_s8 + $0x204] ss:$28 sps:$4 sm:$0xff]   ;;  %v4575_v54 = vld [vmem:[%s6287_s8 + $0x318] ss:$28 sps:$4 sm:$0xff]  }
 0x1b6   :  { %3224 = vmatprep.subr.bf16.mxu0 %v4526_v55  ;;  %v4580_v55 = vld [vmem:[%s6287_s8 + $0x34c] ss:$28 sps:$4 sm:$0xff]  }
 0x1b9   :  { %3225 = vmatpush1.bf16.msra.mxu0 %v4524_v56  ;;  %v4583_v56 = vld [vmem:[%s6287_s8 + $0x354] ss:$28 sps:$4 sm:$0xff]  }
 0x1ba   :  { %3226 = vmatprep.subr.bf16.mxu0 %v4532_v57  ;;  %v4578_v57 = vld [vmem:[%s6287_s8 + $0x348] ss:$28 sps:$4 sm:$0xff]  }
 0x1bd   :  { %3227 = vmatpush1.bf16.msra.mxu0 %v4530_v58  ;;  %v4581_v58 = vld [vmem:[%s6287_s8 + $0x350] ss:$28 sps:$4 sm:$0xff]  }
 0x1be   :  { %3228 = vmatprep.subr.bf16.mxu0 %v4538_v59  ;;  %v4586_v59 = vld [vmem:[%s6287_s8 + $0x384] ss:$28 sps:$4 sm:$0xff]  }
 0x1c1   :  { %3229 = vmatpush1.bf16.msra.mxu0 %v4536_v60  ;;  %v4589_v60 = vld [vmem:[%s6287_s8 + $0x38c] ss:$28 sps:$4 sm:$0xff]  }
 0x1c2   :  { %3230 = vmatprep.subr.bf16.mxu0 %v4544_v61  ;;  %v5842_v61 = vld [vmem:[%s6286_s7] sm:$0xf] }
 0x1c5   :  { %3231 = vmatpush1.bf16.msra.mxu0 %v4542_v62  ;;  %v1918_v62 = vrot.slane %v5842_v61, %v5587_v50 }
 0x1c6   :  { %3232 = vmatprep.subr.bf16.mxu0 %v4550_v63  ;;  %v1922_v63 = vrot.slane %v5842_v61, %v5593_v52 }
 0x1c9   :  { %3233 = vmatpush1.bf16.msra.mxu0 %v4548_v0 }
 0x1ca   :  { %3234 = vmatprep.subr.bf16.mxu0 %v4556_v1 }
 0x1cd   :  { %3235 = vmatpush1.bf16.msra.mxu0 %v4554_v3 }
 0x1ce   :  { %3236 = vmatprep.subr.bf16.mxu0 %v4562_v6 }
 0x1d1   :  { %3237 = vmatpush1.bf16.msra.mxu0 %v4560_v7 }
 0x1d2   :  { %3238 = vmatprep.subr.bf16.mxu0 %v4568_v8 }
 0x1d5   :  { %3239 = vmatpush1.bf16.msra.mxu0 %v4566_v9 }
 0x1d6   :  { %3240 = vmatprep.subr.bf16.mxu0 %v4574_v48  ;;  %v4628_v48 = vld [vmem:[%s6287_s8 + $0x50c] ss:$28 sps:$4 sm:$0xff]  }
 0x1d9   :  { %3241 = vmatpush1.bf16.msra.mxu0 %v4572_v53  ;;  %v4626_v53 = vld [vmem:[%s6287_s8 + $0x508] ss:$28 sps:$4 sm:$0xff]  }
 0x1da   :  { %3242 = vmatprep.subr.bf16.mxu0 %v4580_v55 }
 0x1dd   :  { %3243 = vmatpush1.bf16.msra.mxu0 %v4578_v57  ;;  %v4637_v57 = vld [vmem:[%s6287_s8 + $0x54c] ss:$28 sps:$4 sm:$0xff]  }
 0x1de   :  { %3253 = vmatprep.subr.bf16.mxu0 %v4586_v59  ;;  %v4635_v59 = vld [vmem:[%s6287_s8 + $0x548] ss:$28 sps:$4 sm:$0xff]  }
 0x273   :  { %v4076_v21 = vpop.f32.mrb[4].mxu0 }
 0x274   :  { %v4077_v16 = vpop.f32.mrb[5].mxu0 }
 0x275   :  { %v4078_v22 = vadd.f32 %v4077_v16, %v4076_v21  ;;  %v4079_v23 = vpop.f32.mrb[6].mxu0  ;;  %v4493_v21 = vld [vmem:[%s6287_s8 + $0xc] ss:$28 sps:$4 sm:$0xff]  }
 0x276   :  { %v4080_v24 = vpop.f32.mrb[7].mxu0  ;;  %v4491_v16 = vld [vmem:[%s6287_s8 + $0x8] ss:$28 sps:$4 sm:$0xff]   ;;  %v4497_v23 = vld [vmem:[%s6287_s8 + $0x40] ss:$28 sps:$4 sm:$0xff]  }
 0x277   :  { %v1851_v26 = vadd.f32 %v4078_v22, %v3842_v25  ;;  %v4499_v22 = vld [vmem:[%s6287_s8 + $0x44] ss:$28 sps:$4 sm:$0xff]   ;;  %v4505_v24 = vld [vmem:[%s6287_s8 + $0x7c] ss:$28 sps:$4 sm:$0xff]  }
 0x278   :  { %v4503_v25 = vld [vmem:[%s6287_s8 + $0x78] ss:$28 sps:$4 sm:$0xff]  }
 0x282   :  { %v1890_v27 = vpop.f32.mrb[8].mxu1 }
 0x283   :  { %v5616_v28 = vadd.f32 %v1890_v27, %v1851_v26  ;;  %v1892_v29 = vpop.f32.mrb[9].mxu1  ;;  %v4511_v26 = vld [vmem:[%s6287_s8 + $0xb4] ss:$28 sps:$4 sm:$0xff]  }
 0x284   :  { %v1893_v30 = vpop.f32.mrb[10].mxu1  ;;  %v4509_v27 = vld [vmem:[%s6287_s8 + $0xb0] ss:$28 sps:$4 sm:$0xff]   ;;  %v4515_v29 = vld [vmem:[%s6287_s8 + $0xe8] ss:$28 sps:$4 sm:$0xff]  }
 0x285   :  { %v1897_v31 = vmul.f32 0.5, %v5616_v28  ;;  %3608 = vst [vmem:[#allocation4] sm:$0xff] %v5616_v28  ;;  %v1894_v32 = vpop.f32.mrb[11].mxu1  ;;  %v4523_v30 = vld [vmem:[%s6287_s8 + $0x124] ss:$28 sps:$4 sm:$0xff]  }
 0x286   :  { %v4529_v32 = vld [vmem:[%s6287_s8 + $0x15c] ss:$28 sps:$4 sm:$0xff]  }
 0x287   :  { %v1898_v34 = vmul.f32 1.442695, %v1897_v31  ;;  %v4521_v31 = vld [vmem:[%s6287_s8 + $0x120] ss:$28 sps:$4 sm:$0xff]  }
 0x289   :  { %4738 = vpow2.f32 %v1898_v34  ;;  %v4535_v34 = vld [vmem:[%s6287_s8 + $0x194] ss:$28 sps:$4 sm:$0xff]  }
 0x293   :  { %v4739_v39 = vpop.eup %4738 }
 0x294   :  { %1901 = vrot.lane.b32.xlu0 %v4739_v39, %s4818_s17  ;;  %v4545_v39 = vld [vmem:[%s6287_s8 + $0x200] ss:$28 sps:$4 sm:$0xff]  }
 0x306   :  { %v1902_v11 = vpop.permute.xlu0 %1901 }
 0x307   :  { %v1904_v12 = vmul.f32 %v1902_v11, %v1896_v10 }
 0x309   :  { %v1905_v14 = vadd.f32 %v1904_v12, %v5616_v28  ;;  %v4517_v28 = vld [vmem:[%s6287_s8 + $0xec] ss:$28 sps:$4 sm:$0xff]   ;;  %v4584_v12 = vld [vmem:[%s6287_s8 + $0x380] ss:$28 sps:$4 sm:$0xff]  }
 0x30b   :  { %v1906_v17 = vpack.c.bf16 %v1905_v14, %v1905_v14  ;;  %v1930_v14 = vrot.slane %v5842_v61, %v5601_v5 }
 0x30d   :  { %3878 = vmatmul.mubr.msk.bf16.vlgmr.msra.gmra.mrb[12].mxu1 %vm1965_vm2, %v1906_v17 }
 0x30e   :  { %2024 = vmatpush1.bf16.msra.mxu1 %v4483_v15  ;;  %2055 = vmatprep.mubr.bf16.mxu1 %v4817_v2 }
 0x30f   :  { %3879 = vmatprep.subr.msk.bf16.mxu1 %vm1969_vm1, %v3876_v18  ;;  %v4595_v18 = vld [vmem:[%s6287_s8 + $0x3c4] ss:$28 sps:$4 sm:$0xff]  }
 0x312   :  { %2026 = vmatpush1.bf16.msra.mxu1 %v1977_v20 }
 0x313   :  { %3294 = vmatprep.subr.bf16.mxu1 %v4493_v21 }
 0x315   :  { %3880 = vmatmul.mubr.msk.bf16.vlgmr.msra.gmra.mrb[16].mxu1 %vm1965_vm2, %v1906_v17  ;;  %v4592_v17 = vld [vmem:[%s6287_s8 + $0x3bc] ss:$28 sps:$4 sm:$0xff]  }
 0x316   :  { %3295 = vmatpush1.bf16.msra.mxu1 %v4491_v16 }
 0x317   :  { %3296 = vmatprep.subr.bf16.mxu1 %v4499_v22  ;;  %v4590_v22 = vld [vmem:[%s6287_s8 + $0x3b8] ss:$28 sps:$4 sm:$0xff]  }
 0x31a   :  { %3297 = vmatpush1.bf16.msra.mxu1 %v4497_v23  ;;  %v4593_v23 = vld [vmem:[%s6287_s8 + $0x3c0] ss:$28 sps:$4 sm:$0xff]  }
 0x31b   :  { %3298 = vmatprep.subr.bf16.mxu1 %v4505_v24 }
 0x31e   :  { %3299 = vmatpush1.bf16.msra.mxu1 %v4503_v25  ;;  %v4598_v25 = vld [vmem:[%s6287_s8 + $0x3f4] ss:$28 sps:$4 sm:$0xff]  }
 0x31f   :  { %3300 = vmatprep.subr.bf16.mxu1 %v4511_v26  ;;  %v4601_v26 = vld [vmem:[%s6287_s8 + $0x3fc] ss:$28 sps:$4 sm:$0xff]  }
 0x322   :  { %3301 = vmatpush1.bf16.msra.mxu1 %v4509_v27 }
 0x323   :  { %3302 = vmatprep.subr.bf16.mxu1 %v4517_v28 }
 0x326   :  { %3303 = vmatpush1.bf16.msra.mxu1 %v4515_v29  ;;  %v4596_v29 = vld [vmem:[%s6287_s8 + $0x3f0] ss:$28 sps:$4 sm:$0xff]  }
 0x327   :  { %3304 = vmatprep.subr.bf16.mxu1 %v4523_v30  ;;  %v4599_v30 = vld [vmem:[%s6287_s8 + $0x3f8] ss:$28 sps:$4 sm:$0xff]  }
 0x32a   :  { %3305 = vmatpush1.bf16.msra.mxu1 %v4521_v31  ;;  %v4604_v31 = vld [vmem:[%s6287_s8 + $0x42c] ss:$28 sps:$4 sm:$0xff]  }
 0x32b   :  { %3306 = vmatprep.subr.bf16.mxu1 %v4529_v32  ;;  %v4607_v32 = vld [vmem:[%s6287_s8 + $0x434] ss:$28 sps:$4 sm:$0xff]  }
 0x32e   :  { %3307 = vmatpush1.bf16.msra.mxu1 %v4527_v33  ;;  %v4602_v33 = vld [vmem:[%s6287_s8 + $0x428] ss:$28 sps:$4 sm:$0xff]  }
 0x32f   :  { %3308 = vmatprep.subr.bf16.mxu1 %v4535_v34  ;;  %v4605_v34 = vld [vmem:[%s6287_s8 + $0x430] ss:$28 sps:$4 sm:$0xff]  }
 0x332   :  { %3309 = vmatpush1.bf16.msra.mxu1 %v4533_v35  ;;  %v4610_v35 = vld [vmem:[%s6287_s8 + $0x464] ss:$28 sps:$4 sm:$0xff]  }
 0x333   :  { %3310 = vmatprep.subr.bf16.mxu1 %v4541_v36  ;;  %v4613_v36 = vld [vmem:[%s6287_s8 + $0x46c] ss:$28 sps:$4 sm:$0xff]  }
 0x336   :  { %3311 = vmatpush1.bf16.msra.mxu1 %v4539_v37  ;;  %v4608_v37 = vld [vmem:[%s6287_s8 + $0x460] ss:$28 sps:$4 sm:$0xff]  }
 0x337   :  { %3312 = vmatprep.subr.bf16.mxu1 %v4547_v38  ;;  %v4611_v38 = vld [vmem:[%s6287_s8 + $0x468] ss:$28 sps:$4 sm:$0xff]  }
 0x33a   :  { %3313 = vmatpush1.bf16.msra.mxu1 %v4545_v39  ;;  %v4616_v39 = vld [vmem:[%s6287_s8 + $0x49c] ss:$28 sps:$4 sm:$0xff]  }
 0x33b   :  { %3314 = vmatprep.subr.bf16.mxu1 %v4553_v40  ;;  %v4619_v40 = vld [vmem:[%s6287_s8 + $0x4a4] ss:$28 sps:$4 sm:$0xff]  }
 0x33e   :  { %3315 = vmatpush1.bf16.msra.mxu1 %v4551_v41  ;;  %v4614_v41 = vld [vmem:[%s6287_s8 + $0x498] ss:$28 sps:$4 sm:$0xff]  }
 0x33f   :  { %3316 = vmatprep.subr.bf16.mxu1 %v4559_v42  ;;  %v4617_v42 = vld [vmem:[%s6287_s8 + $0x4a0] ss:$28 sps:$4 sm:$0xff]  }
 0x342   :  { %3317 = vmatpush1.bf16.msra.mxu1 %v4557_v43  ;;  %v4622_v43 = vld [vmem:[%s6287_s8 + $0x4d4] ss:$28 sps:$4 sm:$0xff]  }
 0x343   :  { %3318 = vmatprep.subr.bf16.mxu1 %v4565_v44  ;;  %v4625_v44 = vld [vmem:[%s6287_s8 + $0x4dc] ss:$28 sps:$4 sm:$0xff]  }
 0x346   :  { %3319 = vmatpush1.bf16.msra.mxu1 %v4563_v45  ;;  %v4620_v45 = vld [vmem:[%s6287_s8 + $0x4d0] ss:$28 sps:$4 sm:$0xff]  }
 0x347   :  { %3320 = vmatprep.subr.bf16.mxu1 %v4571_v46  ;;  %v4623_v46 = vld [vmem:[%s6287_s8 + $0x4d8] ss:$28 sps:$4 sm:$0xff]  }
 0x34a   :  { %3321 = vmatpush1.bf16.msra.mxu1 %v4569_v47  ;;  %v1926_v47 = vrot.slane %v5842_v61, %v5598_v4  ;;  %v4640_v61 = vld [vmem:[%s6287_s8 + $0x14] ss:$28 sps:$4 sm:$0xff]  }
 0x34b   :  { %3322 = vmatprep.subr.bf16.mxu1 %v4577_v51  ;;  %v4631_v51 = vld [vmem:[%s6287_s8 + $0x514] ss:$28 sps:$4 sm:$0xff]  }
 0x34e   :  { %3323 = vmatpush1.bf16.msra.mxu1 %v4575_v54  ;;  %v4629_v54 = vld [vmem:[%s6287_s8 + $0x510] ss:$28 sps:$4 sm:$0xff]  }
 0x34f   :  { %3324 = vmatprep.subr.bf16.mxu1 %v4583_v56  ;;  %v4634_v56 = vld [vmem:[%s6287_s8 + $0x544] ss:$28 sps:$4 sm:$0xff]  }
 0x352   :  { %3325 = vmatpush1.bf16.msra.mxu1 %v4581_v58  ;;  %v4632_v58 = vld [vmem:[%s6287_s8 + $0x540] ss:$28 sps:$4 sm:$0xff]  }
 0x353   :  { %3335 = vmatprep.subr.bf16.mxu1 %v4589_v60 }
 0x3e0   :  { %v2016_v0 = vpop.f32.mrb[12].mxu1 }
 0x3e1   :  { %v2017_v1 = vadd.f32 %v2016_v0, %v1918_v62  ;;  %v2018_v3 = vpop.f32.mrb[13].mxu1  ;;  %v4641_v62 = vld [vmem:[%s6287_s8 + $0x1d8] ss:$28 sps:$4 sm:$0xff]  }
 0x3e2   :  { %v2019_v6 = vadd.f32 %v2018_v3, %v1922_v63  ;;  %v2020_v7 = vpop.f32.mrb[14].mxu1  ;;  %v4638_v63 = vld [vmem:[%s6287_s8 + $0x10] ss:$28 sps:$4 sm:$0xff]  }
 0x3e3   :  { %v2064_v8 = vmax.f32 %v2017_v1, 0.0  ;;  %v2021_v9 = vpop.f32.mrb[15].mxu1  ;;  %v4642_v1 = vld [vmem:[%s6287_s8 + $0x18] ss:$28 sps:$4 sm:$0xff]   ;;  %v4645_v3 = vld [vmem:[%s6287_s8 + $0x4c] ss:$28 sps:$4 sm:$0xff]  }
 0x3e4   :  { %v2065_v10 = vmax.f32 %v2019_v6, 0.0  ;;  %v4646_v6 = vld [vmem:[%s6287_s8 + $0x210] ss:$28 sps:$4 sm:$0xff]   ;;  %v4643_v7 = vld [vmem:[%s6287_s8 + $0x48] ss:$28 sps:$4 sm:$0xff]  }
 0x3e5   :  { %v5858_v15 = vpack.c.bf16 %v2064_v8, %v2064_v8  ;;  %v4647_v8 = vld [vmem:[%s6287_s8 + $0x50] ss:$28 sps:$4 sm:$0xff]   ;;  %v4650_v9 = vld [vmem:[%s6287_s8 + $0x84] ss:$28 sps:$4 sm:$0xff]  }
 0x3e6   :  { %v5848_v11 = vpack.c.bf16 %v2065_v10, %v2065_v10  ;;  %v4651_v10 = vld [vmem:[%s6287_s8 + $0x248] ss:$28 sps:$4 sm:$0xff]  }
 0x3e8   :  { %v5866_v19 = vpop.f32.mrb[16].mxu1  ;;  %3244 = vmatprep.mubr.bf16.mxu0 %v5848_v11  ;;  %3326 = vmatprep.mubr.bf16.mxu1 %v5848_v11 }
 0x3e9   :  { %v2059_v20 = vpop.f32.mrb[17].mxu1  ;;  %3245 = vmatmul.mubr.bf16.vlgmr.msra.gmra.mrb[8].mxu0 %v5858_v15  ;;  %3327 = vmatmul.mubr.bf16.vlgmr.msra.gmra.mrb[20].mxu1 %v5858_v15  ;;  %v2058_v55 = vadd.f32 %v5866_v19, %v1926_v47  ;;  %v4660_v19 = vld [vmem:[%s6287_s8 + $0xf4] ss:$28 sps:$4 sm:$0xff]  }
 0x3ea   :  { %v2060_v21 = vadd.f32 %v2059_v20, %v1930_v14  ;;  %3254 = vmatpush1.bf16.msra.mxu0 %v4584_v12  ;;  %3336 = vmatpush1.bf16.msra.mxu1 %v4587_v13  ;;  %v2061_v16 = vpop.f32.mrb[18].mxu1  ;;  %v4648_v12 = vld [vmem:[%s6287_s8 + $0x80] ss:$28 sps:$4 sm:$0xff]   ;;  %v4661_v20 = vld [vmem:[%s6287_s8 + $0x2b8] ss:$28 sps:$4 sm:$0xff]  }
 0x3eb   :  { %v2062_v24 = vpop.f32.mrb[19].mxu1  ;;  %3255 = vmatprep.subr.bf16.mxu0 %v4592_v17  ;;  %3337 = vmatprep.subr.bf16.mxu1 %v4595_v18  ;;  %v2066_v60 = vmax.f32 %v2058_v55, 0.0  ;;  %v4655_v13 = vld [vmem:[%s6287_s8 + $0xbc] ss:$28 sps:$4 sm:$0xff]   ;;  %v4696_v47 = vld [vmem:[%s6287_s8 + $0x2b4] ss:$28 sps:$4 sm:$0xff]  }
 0x3ec   :  { %v2067_v27 = vmax.f32 %v2060_v21, 0.0  ;;  %v4656_v14 = vld [vmem:[%s6287_s8 + $0x280] ss:$28 sps:$4 sm:$0xff]   ;;  %v4653_v17 = vld [vmem:[%s6287_s8 + $0xb8] ss:$28 sps:$4 sm:$0xff]  }
 0x3ed   :  { %v5980_v0 = vpack.c.bf16 %v2066_v60, %v2066_v60  ;;  %v4657_v18 = vld [vmem:[%s6287_s8 + $0xc0] ss:$28 sps:$4 sm:$0xff]   ;;  %v4658_v21 = vld [vmem:[%s6287_s8 + $0xf0] ss:$28 sps:$4 sm:$0xff]   ;;  %v4662_v16 = vld [vmem:[%s6287_s8 + $0xf8] ss:$28 sps:$4 sm:$0xff]  }
 0x3ee   :  { %v5884_v28 = vpack.c.bf16 %v2067_v27, %v2067_v27  ;;  %3256 = vmatpush1.bf16.msra.mxu0 %v4590_v22  ;;  %3338 = vmatpush1.bf16.msra.mxu1 %v4593_v23  ;;  %v4665_v22 = vld [vmem:[%s6287_s8 + $0x12c] ss:$28 sps:$4 sm:$0xff]   ;;  %v4706_v60 = vld [vmem:[%s6287_s8 + $0x358] ss:$28 sps:$4 sm:$0xff]  }
 0x3ef   :  { %3257 = vmatprep.subr.bf16.mxu0 %v4598_v25  ;;  %3339 = vmatprep.subr.bf16.mxu1 %v4601_v26  ;;  %v4666_v23 = vld [vmem:[%s6287_s8 + $0x2f0] ss:$28 sps:$4 sm:$0xff]   ;;  %v4663_v24 = vld [vmem:[%s6287_s8 + $0x128] ss:$28 sps:$4 sm:$0xff]  }
 0x3f0   :  { %4056 = vmatprep.mubr.msk.bf16.mxu0 %vm1266_vm0, %v5884_v28  ;;  %4057 = vmatprep.mubr.msk.bf16.mxu1 %vm1266_vm0, %v5884_v28  ;;  %v4667_v25 = vld [vmem:[%s6287_s8 + $0x130] ss:$28 sps:$4 sm:$0xff]   ;;  %v4670_v26 = vld [vmem:[%s6287_s8 + $0x164] ss:$28 sps:$4 sm:$0xff]  }
 0x3f1   :  { %v4671_v27 = vld [vmem:[%s6287_s8 + $0x328] ss:$28 sps:$4 sm:$0xff]   ;;  %v4701_v55 = vld [vmem:[%s6287_s8 + $0x4b0] ss:$28 sps:$4 sm:$0xff]  }
 0x3f2   :  { %3258 = vmatpush1.bf16.msra.mxu0 %v4596_v29  ;;  %3340 = vmatpush1.bf16.msra.mxu1 %v4599_v30  ;;  %v4668_v29 = vld [vmem:[%s6287_s8 + $0x160] ss:$28 sps:$4 sm:$0xff]   ;;  %v4672_v30 = vld [vmem:[%s6287_s8 + $0x168] ss:$28 sps:$4 sm:$0xff]  }
 0x3f3   :  { %3259 = vmatprep.subr.bf16.mxu0 %v4604_v31  ;;  %3341 = vmatprep.subr.bf16.mxu1 %v4607_v32  ;;  %v4675_v31 = vld [vmem:[%s6287_s8 + $0x19c] ss:$28 sps:$4 sm:$0xff]  }
 0x3f4   :  { %v4676_v32 = vld [vmem:[%s6287_s8 + $0x360] ss:$28 sps:$4 sm:$0xff]  }
 0x3f6   :  { %3260 = vmatpush1.bf16.msra.mxu0 %v4602_v33  ;;  %3342 = vmatpush1.bf16.msra.mxu1 %v4605_v34  ;;  %v4673_v33 = vld [vmem:[%s6287_s8 + $0x198] ss:$28 sps:$4 sm:$0xff]   ;;  %v4677_v34 = vld [vmem:[%s6287_s8 + $0x1a0] ss:$28 sps:$4 sm:$0xff]  }
 0x3f7   :  { %3261 = vmatprep.subr.bf16.mxu0 %v4610_v35  ;;  %3343 = vmatprep.subr.bf16.mxu1 %v4613_v36  ;;  %v4680_v35 = vld [vmem:[%s6287_s8 + $0x1d4] ss:$28 sps:$4 sm:$0xff]  }
 0x3f8   :  { %v4678_v36 = vld [vmem:[%s6287_s8 + $0x1d0] ss:$28 sps:$4 sm:$0xff]  }
 0x3fa   :  { %3262 = vmatpush1.bf16.msra.mxu0 %v4608_v37  ;;  %3344 = vmatpush1.bf16.msra.mxu1 %v4611_v38  ;;  %v4681_v37 = vld [vmem:[%s6287_s8 + $0x398] ss:$28 sps:$4 sm:$0xff]   ;;  %v4684_v38 = vld [vmem:[%s6287_s8 + $0x20c] ss:$28 sps:$4 sm:$0xff]  }
 0x3fb   :  { %3263 = vmatprep.subr.bf16.mxu0 %v4616_v39  ;;  %3345 = vmatprep.subr.bf16.mxu1 %v4619_v40  ;;  %v4682_v39 = vld [vmem:[%s6287_s8 + $0x208] ss:$28 sps:$4 sm:$0xff]   ;;  %v4685_v40 = vld [vmem:[%s6287_s8 + $0x3d0] ss:$28 sps:$4 sm:$0xff]  }
 0x3fe   :  { %3264 = vmatpush1.bf16.msra.mxu0 %v4614_v41  ;;  %3346 = vmatpush1.bf16.msra.mxu1 %v4617_v42  ;;  %v4688_v41 = vld [vmem:[%s6287_s8 + $0x244] ss:$28 sps:$4 sm:$0xff]  }
 0x3ff   :  { %3265 = vmatprep.subr.bf16.mxu0 %v4622_v43  ;;  %3347 = vmatprep.subr.bf16.mxu1 %v4625_v44  ;;  %v4686_v42 = vld [vmem:[%s6287_s8 + $0x240] ss:$28 sps:$4 sm:$0xff]   ;;  %v4689_v43 = vld [vmem:[%s6287_s8 + $0x408] ss:$28 sps:$4 sm:$0xff]  }
 0x400   :  { %v4692_v44 = vld [vmem:[%s6287_s8 + $0x27c] ss:$28 sps:$4 sm:$0xff]  }
 0x402   :  { %3266 = vmatpush1.bf16.msra.mxu0 %v4620_v45  ;;  %3348 = vmatpush1.bf16.msra.mxu1 %v4623_v46  ;;  %v4690_v45 = vld [vmem:[%s6287_s8 + $0x278] ss:$28 sps:$4 sm:$0xff]   ;;  %v4693_v46 = vld [vmem:[%s6287_s8 + $0x440] ss:$28 sps:$4 sm:$0xff]  }
 0x403   :  { %3267 = vmatprep.subr.bf16.mxu0 %v4628_v48  ;;  %3349 = vmatprep.subr.bf16.mxu1 %v4631_v51  ;;  %v4694_v48 = vld [vmem:[%s6287_s8 + $0x2b0] ss:$28 sps:$4 sm:$0xff]   ;;  %v4697_v51 = vld [vmem:[%s6287_s8 + $0x478] ss:$28 sps:$4 sm:$0xff]  }
 0x406   :  { %3268 = vmatpush1.bf16.msra.mxu0 %v4626_v53  ;;  %3350 = vmatpush1.bf16.msra.mxu1 %v4629_v54  ;;  %v4700_v53 = vld [vmem:[%s6287_s8 + $0x2ec] ss:$28 sps:$4 sm:$0xff]  }
 0x407   :  { %3269 = vmatprep.subr.bf16.mxu0 %v4634_v56  ;;  %3351 = vmatprep.subr.bf16.mxu1 %v4637_v57  ;;  %v4698_v54 = vld [vmem:[%s6287_s8 + $0x2e8] ss:$28 sps:$4 sm:$0xff]   ;;  %v4702_v57 = vld [vmem:[%s6287_s8 + $0x320] ss:$28 sps:$4 sm:$0xff]  }
 0x408   :  { %v4704_v56 = vld [vmem:[%s6287_s8 + $0x324] ss:$28 sps:$4 sm:$0xff]  }
 0x40a   :  { %3270 = vmatpush1.bf16.msra.mxu0 %v4632_v58  ;;  %3352 = vmatpush1.bf16.msra.mxu1 %v4635_v59  ;;  %v4705_v58 = vld [vmem:[%s6287_s8 + $0x4e8] ss:$28 sps:$4 sm:$0xff]   ;;  %v4708_v59 = vld [vmem:[%s6287_s8 + $0x35c] ss:$28 sps:$4 sm:$0xff]  }
 0x40b   :  { %3376 = vmatprep.subr.bf16.mxu0 %v4640_v61  ;;  %4082 = vmatprep.subr.bf16.mxu1 %v4641_v62  ;;  %v4709_v61 = vld [vmem:[%s6287_s8 + $0x520] ss:$28 sps:$4 sm:$0xff]   ;;  %v4712_v62 = vld [vmem:[%s6287_s8 + $0x394] ss:$28 sps:$4 sm:$0xff]  }
 0x40d   :  { %3286 = vmatmul.mubr.bf16.vlgmr.msra.gmra.mrb[8].mxu0 %v5980_v0  ;;  %3368 = vmatmul.mubr.bf16.vlgmr.msra.gmra.mrb[20].mxu1 %v5980_v0 }
 0x40e   :  { %3377 = vmatpush1.bf16.msra.mxu0 %v4638_v63  ;;  %3408 = vmatprep.mubr.bf16.mxu0 %v5848_v11  ;;  %v4710_v63 = vld [vmem:[%s6287_s8 + $0x390] ss:$28 sps:$4 sm:$0xff]  }
 0x40f   :  { %4083 = vmatpush3.bf16.msra.mxu1 %v4642_v1  ;;  %3490 = vmatprep.mubr.bf16.mxu1 %v5848_v11  ;;  %v4652_v11 = vld [vmem:[%s6287_s8 + $0x88] ss:$28 sps:$4 sm:$0xff]   ;;  %v4713_v1 = vld [vmem:[%s6287_s8 + $0x558] ss:$28 sps:$4 sm:$0xff]  }
 0x410   :  { %3378 = vmatprep.subr.bf16.mxu0 %v4645_v3  ;;  %4084 = vmatprep.subr.bf16.mxu1 %v4646_v6  ;;  %v4716_v3 = vld [vmem:[%s6287_s8 + $0x3cc] ss:$28 sps:$4 sm:$0xff]  }
 0x411   :  { %v4714_v6 = vld [vmem:[%s6287_s8 + $0x3c8] ss:$28 sps:$4 sm:$0xff]  }
 0x412   :  { %3379 = vmatpush1.bf16.msra.mxu0 %v4643_v7  ;;  %v4719_v7 = vld [vmem:[%s6287_s8 + $0x404] ss:$28 sps:$4 sm:$0xff]  }
 0x413   :  { %4085 = vmatpush3.bf16.msra.mxu1 %v4647_v8  ;;  %3380 = vmatprep.subr.bf16.mxu0 %v4650_v9  ;;  %v4725_v8 = vld [vmem:[%s6287_s8 + $0x474] ss:$28 sps:$4 sm:$0xff]  }
 0x414   :  { %4086 = vmatprep.subr.bf16.mxu1 %v4651_v10  ;;  %v4723_v9 = vld [vmem:[%s6287_s8 + $0x470] ss:$28 sps:$4 sm:$0xff]  }
 0x415   :  { %v4728_v10 = vld [vmem:[%s6287_s8 + $0x4ac] ss:$28 sps:$4 sm:$0xff]  }
 0x416   :  { %3381 = vmatpush1.bf16.msra.mxu0 %v4648_v12  ;;  %v4726_v12 = vld [vmem:[%s6287_s8 + $0x4a8] ss:$28 sps:$4 sm:$0xff]  }
 0x417   :  { %4087 = vmatpush3.bf16.msra.mxu1 %v4652_v11  ;;  %3382 = vmatprep.subr.bf16.mxu0 %v4655_v13  ;;  %v4731_v11 = vld [vmem:[%s6287_s8 + $0x4e4] ss:$28 sps:$4 sm:$0xff]  }
 0x418   :  { %4088 = vmatprep.subr.bf16.mxu1 %v4656_v14  ;;  %v4729_v13 = vld [vmem:[%s6287_s8 + $0x4e0] ss:$28 sps:$4 sm:$0xff]  }
 0x419   :  { %v4734_v14 = vld [vmem:[%s6287_s8 + $0x51c] ss:$28 sps:$4 sm:$0xff]  }
 0x41a   :  { %3383 = vmatpush1.bf16.msra.mxu0 %v4653_v17  ;;  %v4732_v17 = vld [vmem:[%s6287_s8 + $0x518] ss:$28 sps:$4 sm:$0xff]  }
 0x41b   :  { %4089 = vmatpush3.bf16.msra.mxu1 %v4657_v18  ;;  %3384 = vmatprep.subr.bf16.mxu0 %v4660_v19  ;;  %v4737_v18 = vld [vmem:[%s6287_s8 + $0x554] ss:$28 sps:$4 sm:$0xff]  }
 0x41c   :  { %4090 = vmatprep.subr.bf16.mxu1 %v4661_v20  ;;  %v4735_v19 = vld [vmem:[%s6287_s8 + $0x550] ss:$28 sps:$4 sm:$0xff]   ;;  %v6222_v20 = vld [vmem:[%s6288_s9] sm:$0x7f] }
 0x41e   :  { %3385 = vmatpush1.bf16.msra.mxu0 %v4658_v21  ;;  %v2277_v21 = vrot.slane %v6222_v20, %v5587_v50 }
 0x41f   :  { %4091 = vmatpush3.bf16.msra.mxu1 %v4662_v16  ;;  %3386 = vmatprep.subr.bf16.mxu0 %v4665_v22  ;;  %v2285_v16 = vrot.slane %v6222_v20, %v5598_v4  ;;  %v2281_v22 = vrot.slane %v6222_v20, %v5593_v52 }
 0x420   :  { %4092 = vmatprep.subr.bf16.mxu1 %v4666_v23  ;;  %v2289_v23 = vrot.slane %v6222_v20, %v5601_v5 }
 0x422   :  { %3387 = vmatpush1.bf16.msra.mxu0 %v4663_v24 }
 0x423   :  { %4093 = vmatpush3.bf16.msra.mxu1 %v4667_v25  ;;  %3388 = vmatprep.subr.bf16.mxu0 %v4670_v26 }
 0x424   :  { %4094 = vmatprep.subr.bf16.mxu1 %v4671_v27 }
 0x426   :  { %3389 = vmatpush1.bf16.msra.mxu0 %v4668_v29 }
 0x427   :  { %4095 = vmatpush3.bf16.msra.mxu1 %v4672_v30  ;;  %3390 = vmatprep.subr.bf16.mxu0 %v4675_v31 }
 0x428   :  { %4096 = vmatprep.subr.bf16.mxu1 %v4676_v32 }
 0x42a   :  { %3391 = vmatpush1.bf16.msra.mxu0 %v4673_v33 }
 0x42b   :  { %4097 = vmatpush3.bf16.msra.mxu1 %v4677_v34  ;;  %3392 = vmatprep.subr.bf16.mxu0 %v4680_v35 }
 0x42c   :  { %3498 = vmatprep.subr.bf16.mxu1 %v4817_v2 }
 0x42e   :  { %3491 = vmatmul.mubr.bf16.vlgmr.msra.gmra.mrb[24].mxu1 %v5858_v15  ;;  %3393 = vmatpush1.bf16.msra.mxu0 %v4678_v36 }
 0x42f   :  { %3499 = vmatpush1.bf16.msra.mxu1 %v4681_v37  ;;  %4059 = vmatprep.mubr.msk.bf16.mxu1 %vm1266_vm0, %v5884_v28 }
 0x430   :  { %3394 = vmatprep.subr.bf16.mxu0 %v4684_v38  ;;  %3500 = vmatprep.subr.bf16.mxu1 %v4817_v2 }
 0x432   :  { %3395 = vmatpush1.bf16.msra.mxu0 %v4682_v39 }
 0x433   :  { %3501 = vmatpush1.bf16.msra.mxu1 %v4685_v40  ;;  %3396 = vmatprep.subr.bf16.mxu0 %v4688_v41 }
 0x434   :  { %3502 = vmatprep.subr.bf16.mxu1 %v4817_v2 }
 0x436   :  { %3397 = vmatpush1.bf16.msra.mxu0 %v4686_v42 }
 0x437   :  { %3503 = vmatpush1.bf16.msra.mxu1 %v4689_v43  ;;  %3398 = vmatprep.subr.bf16.mxu0 %v4692_v44 }
 0x438   :  { %3504 = vmatprep.subr.bf16.mxu1 %v4817_v2 }
 0x43a   :  { %3399 = vmatpush1.bf16.msra.mxu0 %v4690_v45 }
 0x43b   :  { %3505 = vmatpush1.bf16.msra.mxu1 %v4693_v46  ;;  %3400 = vmatprep.subr.bf16.mxu0 %v4696_v47 }
 0x43c   :  { %3506 = vmatprep.subr.bf16.mxu1 %v4817_v2 }
 0x43e   :  { %3401 = vmatpush1.bf16.msra.mxu0 %v4694_v48 }
 0x43f   :  { %3507 = vmatpush1.bf16.msra.mxu1 %v4697_v51  ;;  %3402 = vmatprep.subr.bf16.mxu0 %v4700_v53 }
 0x440   :  { %3508 = vmatprep.subr.bf16.mxu1 %v4817_v2 }
 0x442   :  { %3403 = vmatpush1.bf16.msra.mxu0 %v4698_v54 }
 0x443   :  { %3509 = vmatpush1.bf16.msra.mxu1 %v4701_v55  ;;  %3404 = vmatprep.subr.bf16.mxu0 %v4704_v56 }
 0x444   :  { %3510 = vmatprep.subr.bf16.mxu1 %v4817_v2 }
 0x446   :  { %3405 = vmatpush1.bf16.msra.mxu0 %v4702_v57 }
 0x447   :  { %3511 = vmatpush1.bf16.msra.mxu1 %v4705_v58  ;;  %3406 = vmatprep.subr.bf16.mxu0 %v4708_v59 }
 0x448   :  { %3512 = vmatprep.subr.bf16.mxu1 %v4817_v2 }
 0x44a   :  { %3407 = vmatpush1.bf16.msra.mxu0 %v4706_v60 }
 0x44b   :  { %3513 = vmatpush1.bf16.msra.mxu1 %v4709_v61  ;;  %3417 = vmatprep.subr.bf16.mxu0 %v4712_v62 }
 0x44c   :  { %3514 = vmatprep.subr.bf16.mxu1 %v4817_v2  ;;  %v4717_v2 = vld [vmem:[%s6287_s8 + $0x400] ss:$28 sps:$4 sm:$0xff]  }
 0x44d   :  { %3409 = vmatmul.mubr.bf16.vlgmr.msra.gmra.mrb[12].mxu0 %v5858_v15  ;;  %v4722_v15 = vld [vmem:[%s6287_s8 + $0x43c] ss:$28 sps:$4 sm:$0xff]  }
 0x44e   :  { %3418 = vmatpush1.bf16.msra.mxu0 %v4710_v63  ;;  %4058 = vmatprep.mubr.msk.bf16.mxu0 %vm1266_vm0, %v5884_v28  ;;  %v4720_v28 = vld [vmem:[%s6287_s8 + $0x438] ss:$28 sps:$4 sm:$0xff]   ;;  %s4819_s8 = smov [#allocation4]  }
 0x44f   :  { %3515 = vmatpush1.bf16.msra.mxu1 %v4713_v1  ;;  %3419 = vmatprep.subr.bf16.mxu0 %v4716_v3  ;;  %s3625_s9 = sshll.u32 %s4819_s8, 4  ;;  %s3626_s9 = int_to_ptr.vmem [resolvable:$true] %s3625_s9 }
 0x450   :  { %s4769_s30 = scalar_lea.vmem %s3626_s9, 128  ;;  %p4774_p1 = scmp.lt.s32.totalorder %s3626_s9, %s3626_s9 }
 0x451   :  { %p4770_p0 = scmp.ne.s32.totalorder %s3626_s9, %s4769_s30  ;;  %p4775_p2 = scmp.lt.s32.totalorder %s4769_s30, %s4769_s30 }
 0x452   :  { %3531 = vmatmul.mubr.bf16.vlgmr.msra.gmra.mrb[28].mxu1 %v5980_v0  ;;  %3420 = vmatpush1.bf16.msra.mxu0 %v4714_v6 }
 0x453   :  { %3421 = vmatprep.subr.bf16.mxu0 %v4719_v7  ;;  %p4776_p3 = por %p4775_p2, %p4774_p1 }
 0x455   :  { %p4777_p4 = pnand %p4776_p3, %p4770_p0 }
 0x456   :  { %3422 = vmatpush1.bf16.msra.mxu0 %v4717_v2 }
 0x457   :  { %3423 = vmatprep.subr.bf16.mxu0 %v4722_v15 }
 0x45a   :  { %3424 = vmatpush1.bf16.msra.mxu0 %v4720_v28 }
 0x45b   :  { %3425 = vmatprep.subr.bf16.mxu0 %v4725_v8 }
 0x45e   :  { %3426 = vmatpush1.bf16.msra.mxu0 %v4723_v9 }
 0x45f   :  { %3427 = vmatprep.subr.bf16.mxu0 %v4728_v10 }
 0x462   :  { %3428 = vmatpush1.bf16.msra.mxu0 %v4726_v12 }
 0x463   :  { %3429 = vmatprep.subr.bf16.mxu0 %v4731_v11 }
 0x466   :  { %3430 = vmatpush1.bf16.msra.mxu0 %v4729_v13 }
 0x467   :  { %3431 = vmatprep.subr.bf16.mxu0 %v4734_v14 }
 0x46a   :  { %3432 = vmatpush1.bf16.msra.mxu0 %v4732_v17 }
 0x46b   :  { %3433 = vmatprep.subr.bf16.mxu0 %v4737_v18 }
 0x46e   :  { %3434 = vmatpush1.bf16.msra.mxu0 %v4735_v19 }
 0x471   :  { %3450 = vmatmul.mubr.bf16.vlgmr.msra.gmra.mrb[12].mxu0 %v5980_v0 }
 0x4e0   :  { %v3287_v24 = vpop.f32.mrb[8].mxu0  ;;  %v3369_v25 = vpop.f32.mrb[20].mxu1 }
 0x4e1   :  { %v6232_v0 = vadd.f32 %v3287_v24, %v2277_v21  ;;  %v6234_v26 = vadd.f32 %v3369_v25, %v2285_v16  ;;  %v3289_v27 = vpop.f32.mrb[9].mxu0  ;;  %v3371_v29 = vpop.f32.mrb[21].mxu1 }
 0x4e2   :  { %v6236_v30 = vadd.f32 %v3289_v27, %v2281_v22  ;;  %v6238_v50 = vadd.f32 %v3371_v29, %v2289_v23  ;;  %v3291_v31 = vpop.f32.mrb[10].mxu0  ;;  %v3373_v4 = vpop.f32.mrb[22].mxu1 }
 0x4e3   :  { %v3538_v32 = vand.u32 2147483647, %v6232_v0  ;;  %v3540_v52 = vand.u32 2147483647, %v6234_v26  ;;  %v3292_v36 = vpop.f32.mrb[11].mxu0  ;;  %v3374_v37 = vpop.f32.mrb[23].mxu1 }
 0x4e4   :  { %v3539_v5 = vand.u32 2147483647, %v6236_v30  ;;  %v3541_v33 = vand.u32 2147483647, %v6238_v50 }
 0x4e5   :  { %v3545_v34 = vsub.f32 0.0, %v3538_v32  ;;  %v3547_v35 = vsub.f32 0.0, %v3540_v52 }
 0x4e6   :  { %v3546_v38 = vsub.f32 0.0, %v3539_v5  ;;  %v3548_v39 = vsub.f32 0.0, %v3541_v33 }
 0x4e7   :  { %v3552_v40 = vmul.f32 1.442695, %v3545_v34  ;;  %v3556_v41 = vmul.f32 1.442695, %v3547_v35 }
 0x4e8   :  { %v3554_v42 = vmul.f32 1.442695, %v3546_v38  ;;  %v3558_v43 = vmul.f32 1.442695, %v3548_v39 }
 0x4e9   :  { %4740 = vpow2.f32 %v3552_v40 }
 0x4ea   :  { %4742 = vpow2.f32 %v3556_v41 }
 0x4eb   :  { %4744 = vpow2.f32 %v3554_v42 }
 0x4ec   :  { %4746 = vpow2.f32 %v3558_v43 }
 0x4ed   :  { %4780 = shalt.err (!%p4777_p4)
}
 0x4ee   :  { %s4781_s13 = scalar_lea.hbm %s6290_s11, 128 }
 0x4ef   :  { %p4782_p5 = scmp.ne.s32.totalorder %s6290_s11, %s4781_s13  ;;  %p4785_p6 = scmp.lt.u32.totalorder %s4781_s13, %s6290_s11 }
 0x4f1   :  { %p4787_p7 = pnand %p4785_p6, %p4782_p5 }
 0x4f3   :  { %4790 = shalt.err (!%p4787_p7)
}
 0x4f4   :  { %3628 = dma.vmem_to_hbm [thread:$0]  %s3626_s9, 128, %s6290_s11, [#allocation5]   ;;  %v4741_v44 = vpop.eup %4740  ;;  %vm3580_vm3 = vcmp.ge.f32.partialorder %v6232_v0, 0.0  ;;  %vm3582_vm4 = vcmp.ge.f32.partialorder %v6234_v26, 0.0  ;;  %vm3581_vm5 = vcmp.ge.f32.partialorder %v6236_v30, 0.0  ;;  %vm3583_vm6 = vcmp.ge.f32.partialorder %v6238_v50, 0.0 }
 0x4f5   :  { %v4743_v45 = vpop.eup %4742  ;;  %v3566_v46 = vadd.f32 1.0, %v4741_v44  ;;  %v2300_v9 = vsub.s32 6, %v5584_v49  ;;  %v2292_v24 = vsub.s32 4, %v5584_v49  ;;  %v2296_v25 = vsub.s32 5, %v5584_v49  ;;  %s4820_s11 = smov [#allocation2]  }
 0x4f6   :  { %v4745_v47 = vpop.eup %4744  ;;  %v3568_v48 = vadd.f32 1.0, %v4743_v45  ;;  %s3615_s19 = sshll.u32 %s4820_s11, 4  ;;  %s3616_s19 = int_to_ptr.vmem [resolvable:$true] %s3615_s19 }
 0x4f7   :  { %v4747_v51 = vpop.eup %4746  ;;  %4748 = vrcp.f32 %v3566_v46  ;;  %v3567_v53 = vadd.f32 1.0, %v4745_v47  ;;  %v2301_v10 = vrot.slane %v6222_v20, %v2300_v9  ;;  %v2293_v0 = vrot.slane %v6222_v20, %v2292_v24  ;;  %s4791_s20 = scalar_lea.vmem %s3616_s19, 896  ;;  %p4796_p9 = scmp.lt.s32.totalorder %s3616_s19, %s3616_s19 }
 0x4f8   :  { %4750 = vrcp.f32 %v3568_v48  ;;  %v3569_v54 = vadd.f32 1.0, %v4747_v51  ;;  %v2297_v26 = vrot.slane %v6222_v20, %v2296_v25  ;;  %p4792_p8 = scmp.ne.s32.totalorder %s3616_s19, %s4791_s20  ;;  %p4797_p10 = scmp.lt.s32.totalorder %s4791_s20, %s4791_s20 }
 0x4f9   :  { %4752 = vrcp.f32 %v3567_v53 }
 0x4fa   :  { %4754 = vrcp.f32 %v3569_v54  ;;  %p4798_p11 = por %p4797_p10, %p4796_p9 }
 0x4fc   :  { %p4799_p12 = pnand %p4798_p11, %p4792_p8 }
 0x501   :  { %v4749_v55 = vpop.eup %4748  ;;  %v4098_v58 = vpop.f32.mrb[24].mxu1 }
 0x502   :  { %v4751_v56 = vpop.eup %4750  ;;  %v3587_v57 = vmul.f32 %v4749_v55, %v4741_v44  ;;  %v4099_v61 = vpop.f32.mrb[25].mxu1 }
 0x503   :  { %v4753_v59 = vpop.eup %4752  ;;  %v3589_v60 = vmul.f32 %v4751_v56, %v4743_v45  ;;  %v4100_v3 = vadd.f32 %v4099_v61, %v4098_v58  ;;  %v4101_v6 = vpop.f32.mrb[26].mxu1 }
 0x504   :  { %v4755_v62 = vpop.eup %4754  ;;  %v3594_v63 = vsel %vm3580_vm3, %v4749_v55, %v3587_v57  ;;  %v3588_v1 = vmul.f32 %v4753_v59, %v4745_v47  ;;  %v4102_v15 = vpop.f32.mrb[27].mxu1 }
 0x505   :  { %3601 = vst [vmem:[#allocation2] sm:$0xff] %v3594_v63  ;;  %v3596_v7 = vsel %vm3582_vm4, %v4751_v56, %v3589_v60  ;;  %v3590_v2 = vmul.f32 %v4755_v62, %v4747_v51  ;;  %v3493_v12 = vadd.f32 %v4100_v3, %v2301_v10 }
 0x506   :  { %3603 = vst [vmem:[#allocation2 + $0x10] sm:$0xff] %v3596_v7  ;;  %v3595_v28 = vsel %vm3581_vm5, %v4753_v59, %v3588_v1 }
 0x507   :  { %3602 = vst [vmem:[#allocation2 + $0x8] sm:$0xff] %v3595_v28  ;;  %v3597_v8 = vsel %vm3583_vm6, %v4755_v62, %v3590_v2 }
 0x508   :  { %3604 = vst [vmem:[#allocation2 + $0x18] sm:$0xff] %v3597_v8 }
 0x525   :  { %v3532_v11 = vpop.f32.mrb[28].mxu1 }
 0x526   :  { %v3533_v13 = vadd.f32 %v3532_v11, %v3493_v12  ;;  %v3534_v14 = vpop.f32.mrb[29].mxu1 }
 0x527   :  { %v3535_v17 = vpop.f32.mrb[30].mxu1 }
 0x528   :  { %v3544_v18 = vand.u32 2147483647, %v3533_v13  ;;  %v3536_v19 = vpop.f32.mrb[31].mxu1  ;;  %vm3586_vm7 = vcmp.ge.f32.partialorder %v3533_v13, 0.0 }
 0x52a   :  { %v3551_v21 = vsub.f32 0.0, %v3544_v18 }
 0x52c   :  { %v3564_v16 = vmul.f32 1.442695, %v3551_v21 }
 0x52e   :  { %4756 = vpow2.f32 %v3564_v16 }
 0x538   :  { %v4757_v22 = vpop.eup %4756 }
 0x539   :  { %v3572_v23 = vadd.f32 1.0, %v4757_v22 }
 0x53b   :  { %4758 = vrcp.f32 %v3572_v23 }
 0x544   :  { %v3451_v27 = vpop.f32.mrb[12].mxu0 }
 0x545   :  { %v4759_v29 = vpop.eup %4758  ;;  %v4114_v30 = vadd.f32 %v3451_v27, %v2293_v0  ;;  %v3453_v50 = vpop.f32.mrb[13].mxu0 }
 0x546   :  { %v3593_v31 = vmul.f32 %v4759_v29, %v4757_v22  ;;  %v4115_v4 = vadd.f32 %v3453_v50, %v2297_v26  ;;  %v3455_v32 = vpop.f32.mrb[14].mxu0 }
 0x547   :  { %v3542_v52 = vand.u32 2147483647, %v4114_v30  ;;  %v3456_v5 = vpop.f32.mrb[15].mxu0  ;;  %vm3584_vm8 = vcmp.ge.f32.partialorder %v4114_v30, 0.0 }
 0x548   :  { %v3600_v33 = vsel %vm3586_vm7, %v4759_v29, %v3593_v31  ;;  %v3543_v34 = vand.u32 2147483647, %v4115_v4  ;;  %vm3585_vm9 = vcmp.ge.f32.partialorder %v4115_v4, 0.0 }
 0x549   :  { %3607 = vst.msk [vmem:[#allocation2 + $0x30] sm:$0xff] %vm1266_vm0, %v3600_v33  ;;  %v3549_v35 = vsub.f32 0.0, %v3542_v52 }
 0x54a   :  { %v3550_v49 = vsub.f32 0.0, %v3543_v34 }
 0x54b   :  { %v3560_v36 = vmul.f32 1.442695, %v3549_v35 }
 0x54c   :  { %v3562_v37 = vmul.f32 1.442695, %v3550_v49 }
 0x54d   :  { %4760 = vpow2.f32 %v3560_v36 }
 0x54e   :  { %4762 = vpow2.f32 %v3562_v37 }
 0x557   :  { %v4761_v20 = vpop.eup %4760 }
 0x558   :  { %v4763_v38 = vpop.eup %4762  ;;  %v3570_v39 = vadd.f32 1.0, %v4761_v20 }
 0x559   :  { %v3571_v40 = vadd.f32 1.0, %v4763_v38 }
 0x55a   :  { %4764 = vrcp.f32 %v3570_v39 }
 0x55b   :  { %4766 = vrcp.f32 %v3571_v40 }
 0x564   :  { %v4765_v41 = vpop.eup %4764 }
 0x565   :  { %v4767_v42 = vpop.eup %4766  ;;  %v3591_v43 = vmul.f32 %v4765_v41, %v4761_v20 }
 0x566   :  { %v3592_v44 = vmul.f32 %v4767_v42, %v4763_v38 }
 0x567   :  { %v3598_v45 = vsel %vm3584_vm8, %v4765_v41, %v3591_v43 }
 0x568   :  { %3605 = vst [vmem:[#allocation2 + $0x20] sm:$0xff] %v3598_v45  ;;  %v3599_v46 = vsel %vm3585_vm9, %v4767_v42, %v3592_v44 }
 0x569   :  { %3606 = vst [vmem:[#allocation2 + $0x28] sm:$0xff] %v3599_v46 }
 0x56a   :  { %4802 = shalt.err (!%p4799_p12)
}
 0x56b   :  { %s4803_s23 = scalar_lea.hbm %s6289_s10, 896 }
 0x56c   :  { %p4804_p13 = scmp.ne.s32.totalorder %s6289_s10, %s4803_s23  ;;  %p4807_p0 = scmp.lt.u32.totalorder %s4803_s23, %s6289_s10 }
 0x56e   :  { %p4809_p1 = pnand %p4807_p0, %p4804_p13 }
 0x570   :  { %4812 = shalt.err (!%p4809_p1)
}
 0x571   :  { %3618 = dma.vmem_to_hbm [thread:$0]  %s3616_s19, 896, %s6289_s10, [#allocation3]  }
 0x572   :  { %4813 = dma.done.wait [#allocation3], 896  }
 0x573   :  { %4814 = vsyncadd [#allocation3], 4294966400 }
 0x574   :  { %4815 = dma.done.wait [#allocation5], 128  }
 0x575   :  { %4816 = vsyncadd [#allocation5], 4294967168 }
 0x576   :  { %3635 = vsyncpa [#allocation3], 1 }
 0x577   :  { %3636 = vsyncpa [#allocation5], 1 }

</bundles_post_ra>
